<compile_context>
chip_gen: v7x
topology: tpu7x:2x2x1
jax: 0.10.0
libtpu: 0.0.40
codegen_flags: <defaults>
</compile_context>

<pallas_src>
import functools

import jax
import jax.numpy as jnp
from jax import lax
from jax.experimental import pallas as pl
from jax.experimental.pallas import tpu as pltpu


# ----------------------------------------------------------------------------- kernel
def _output_context_kernel(xblk_ref, w_ref, g_ref, beta_ref, o_ref, xcol_ref,
                           *, n_time, batch_block, kernel_size, c_in, eps,
                           neg_slope):
    # xblk_ref : (Bt, C_in, T+K-1) padded input block for this batch group
    # w_ref    : (F, K*C_in + 1)   (j,c)-ordered conv weights, bias as last column
    # g_ref    : (F, T)            LayerNorm gamma
    # beta_ref : (F, T)            LayerNorm beta
    # o_ref    : (F, Bt*T)         lane-packed output block
    # xcol_ref : (K*C_in + 1, Bt*T) VMEM scratch for the im2col slab
    T, Bt, K, C = n_time, batch_block, kernel_size, c_in
    n_filters, lanes = o_ref.shape
    kc = K * C

    # ---- Build the im2col slab in VMEM from the resident padded block.
    # Last row is ones so the conv bias rides the matmul contraction.
    xcol_ref[kc:kc + 1, :] = jnp.ones((1, lanes), jnp.float32)
    for bb in range(Bt):                              # static unroll (small Bt)
        xb = xblk_ref[bb]                             # (C, T + K - 1)
        for j in range(K):                            # static unroll (small K)
            xcol_ref[j * C:(j + 1) * C, bb * T:(bb + 1) * T] = xb[:, j:j + T]
    # TODO(synk): for production-sized K (module default kernel=64) build the slab
    # with pltpu.roll / a packed-sequence tap loop instead of K*Bt static slices.

    # ---- Conv1d as ONE MXU matmul (bias folded in): (F, KC+1) x (KC+1, Bt*T).
    acc = jnp.dot(w_ref[...], xcol_ref[...], preferred_element_type=jnp.float32)

    # ---- LayerNorm over (F, T) per packed batch segment.
    # Two-pass (centered) variance for numerical stability vs. E[x^2]-E[x]^2.
    inv_n = 1.0 / (n_filters * T)
    lane_idx = lax.broadcasted_iota(jnp.int32, (1, lanes), 1)

    col_sum = jnp.sum(acc, axis=0, keepdims=True)          # (1, lanes) sublane reduce
    mean_row = jnp.zeros((1, lanes), jnp.float32)
    for bb in range(Bt):                                   # tiny lane-slice reductions
        mu = jnp.sum(col_sum[:, bb * T:(bb + 1) * T]) * inv_n
        seg = (lane_idx >= bb * T) & (lane_idx < (bb + 1) * T)
        mean_row = jnp.where(seg, mu, mean_row)

    centered = acc - mean_row                              # reused below (no extra pass)
    col_sq = jnp.sum(centered * centered, axis=0, keepdims=True)   # (1, lanes)
    rstd_row = jnp.zeros((1, lanes), jnp.float32)
    for bb in range(Bt):
        var = jnp.sum(col_sq[:, bb * T:(bb + 1) * T]) * inv_n
        seg = (lane_idx >= bb * T) & (lane_idx < (bb + 1) * T)
        rstd_row = jnp.where(seg, lax.rsqrt(var + eps), rstd_row)

    # ---- Affine (gamma/beta tiled in-kernel) fused into one scale/shift + LeakyReLU.
    scale = rstd_row * jnp.tile(g_ref[...], (1, Bt))        # (F, Bt*T)
    shift = jnp.tile(beta_ref[...], (1, Bt))
    y = centered * scale + shift
    y = jnp.where(y >= 0, y, neg_slope * y)
    o_ref[...] = y.astype(o_ref.dtype)


# ----------------------------------------------------------------------------- tiling
def _vmem_bytes_estimate(Bt, T, C_in, K, F_out):
    """Rough per-step VMEM footprint (double-buffered blocks + scratch + params)."""
    T_p = T + K - 1
    lanes = Bt * T
    xin = 2 * Bt * C_in * T_p * 4          # streamed input block (double-buffered)
    xout = 2 * F_out * lanes * 4           # output block (double-buffered)
    xcol = (K * C_in + 1) * lanes * 4      # im2col scratch
    params = (F_out * (K * C_in + 1) + 2 * F_out * T) * 4
    return xin + xout + xcol + params


def _vmem_capacity_bytes():
    try:
        info = pltpu.get_tpu_info()
        cap = getattr(info, "vmem_capacity_bytes", None)
        if cap:
            return int(cap)
    except Exception:
        pass
    return 64 * 1024 * 1024                # conservative (v7x per-TC)


def _tensorcores_per_chip():
    """Heuristic: keep >=2 parallel grid steps on multi-TensorCore chips (v7x)."""
    try:
        kind = jax.devices()[0].device_kind.lower()
    except Exception:
        return 1
    if any(tag in kind for tag in ("v7", "7x", "v4", "v5p")):
        return 2
    return 1


def _pick_batch_block(B, T, C_in, K, F_out, *, want_groups, vmem_budget):
    """Batch elements packed along the lane (time) axis per grid step."""
    divs = [d for d in range(1, B + 1) if B % d == 0]
    feas = [d for d in divs
            if _vmem_bytes_estimate(d, T, C_in, K, F_out) <= vmem_budget] or [1]

    def choose(cands):
        # Largest tile (fewest grid steps) that still leaves `want_groups` steps
        # for the parallel grid axis when the batch allows it.
        multi = [d for d in cands if B // d >= want_groups]
        return (multi or cands)[-1]

    dense = [d for d in feas if (d * T) % 128 == 0]
    if dense:                              # lane-dense output stores (no vst.msk)
        return choose(dense)
    # TODO(synk): pad the packed lane axis up to a multiple of 128 (masking the
    # stats) instead of accepting masked partial stores in this fallback.
    big = [d for d in feas if d * T >= 128]
    if big:
        return choose(big)
    return feas[-1]


# ----------------------------------------------------------------------------- wrapper
def output_context(x, w, b, gamma, beta, *, eps=1e-5, neg_slope=0.01,
                   batch_block=None):
    """x: (B, C_in, T); w: (F, C_in, K); b: (F,); gamma/beta: (F, T) -> (B, F, T)."""
    B, C_in, T = x.shape
    F_out, _, K = w.shape

    vmem_phys = _vmem_capacity_bytes()
    want_groups = _tensorcores_per_chip()
    if batch_block is None:
        Bt = _pick_batch_block(B, T, C_in, K, F_out, want_groups=want_groups,
                               vmem_budget=int(0.4 * vmem_phys))
    else:
        Bt = batch_block
    assert B % Bt == 0, (B, Bt)
    Bg = B // Bt
    lanes = Bt * T
    T_p = T + K - 1

    # PyTorch padding='same' (stride 1): total = K-1, left = total//2, right = rest.
    pad_left = (K - 1) // 2
    pad_right = (K - 1) - pad_left
    x_pad = jnp.pad(x, ((0, 0), (0, 0), (pad_left, pad_right)))
    x_blk = x_pad.reshape(Bg, Bt, C_in, T_p)           # leading-dim reshape (free)

    # (j, c)-ordered flattened conv weights with the bias folded in as last column.
    w2 = jnp.concatenate(
        [jnp.transpose(w, (0, 2, 1)).reshape(F_out, K * C_in), b[:, None]], axis=1)

    kernel = functools.partial(
        _output_context_kernel, n_time=T, batch_block=Bt, kernel_size=K,
        c_in=C_in, eps=eps, neg_slope=neg_slope)

    est = _vmem_bytes_estimate(Bt, T, C_in, K, F_out)
    vmem_limit = int(min(0.9 * vmem_phys, max(2 * est, 32 * 1024 * 1024)))

    out = pl.pallas_call(
        kernel,
        out_shape=jax.ShapeDtypeStruct((Bg, F_out, lanes), x.dtype),
        grid_spec=pltpu.PrefetchScalarGridSpec(
            num_scalar_prefetch=0,
            grid=(Bg,),
            in_specs=[
                pl.BlockSpec((None, Bt, C_in, T_p), lambda g: (g, 0, 0, 0)),
                pl.BlockSpec((F_out, K * C_in + 1), lambda g: (0, 0)),
                pl.BlockSpec((F_out, T), lambda g: (0, 0)),
                pl.BlockSpec((F_out, T), lambda g: (0, 0)),
            ],
            out_specs=pl.BlockSpec((None, F_out, lanes), lambda g: (g, 0, 0)),
            scratch_shapes=[pltpu.VMEM((K * C_in + 1, lanes), jnp.float32)],
        ),
        compiler_params=pltpu.CompilerParams(
            dimension_semantics=("parallel",),
            vmem_limit_bytes=vmem_limit),
    )(x_blk, w2, gamma, beta)

    # Unpack the lane-packed batches back to (B, F, T).
    return out.reshape(Bg, F_out, Bt, T).transpose(0, 2, 1, 3).reshape(B, F_out, T)


# ----------------------------------------------------------------------------- reference
def _reference(x, w, b, gamma, beta, eps=1e-5, neg_slope=0.01):
    K = w.shape[-1]
    pad_total = K - 1
    pad = (pad_total // 2, pad_total - pad_total // 2)
    y = lax.conv_general_dilated(x, w, window_strides=(1,), padding=[pad],
                                 dimension_numbers=('NCH', 'OIH', 'NCH'))
    y = y + b[None, :, None]
    mean = jnp.mean(y, axis=(1, 2), keepdims=True)
    var = jnp.var(y, axis=(1, 2), keepdims=True)
    y = (y - mean) / jnp.sqrt(var + eps)
    y = y * gamma[None] + beta[None]
    return jnp.where(y >= 0, y, neg_slope * y)


if __name__ == "__main__":
    # Small shapes consistent with the module:
    # filter_=8, kernel=6, input_channels=8, time_dimension=32, batch=8.
    B, C_in, F_out, K, T = 8, 8, 8, 6, 32

    key = jax.random.PRNGKey(0)
    k1, k2, k3, k4, k5 = jax.random.split(key, 5)
    x = jax.random.normal(k1, (B, C_in, T), jnp.float32)
    w = jax.random.normal(k2, (F_out, C_in, K), jnp.float32) / (C_in * K) ** 0.5
    b = 0.1 * jax.random.normal(k3, (F_out,), jnp.float32)
    gamma = 1.0 + 0.1 * jax.random.normal(k4, (F_out, T), jnp.float32)
    beta = 0.1 * jax.random.normal(k5, (F_out, T), jnp.float32)

    out = jax.block_until_ready(output_context(x, w, b, gamma, beta))
    ref = _reference(x, w, b, gamma, beta)

    assert out.shape == (B, F_out, T), out.shape
    assert jnp.allclose(out, ref, rtol=1e-4, atol=1e-4), \
        float(jnp.max(jnp.abs(out - ref)))
    print("KERNEL_OK")
</pallas_src>

<mosaic_0001>
module attributes {stable_mosaic.version = 11 : i64} {
  func.func @_output_context_kernel(%arg0: i32, %arg1: memref<1x8x8x37xf32, #tpu.memory_space<vmem>>, %arg2: memref<8x49xf32, #tpu.memory_space<vmem>>, %arg3: memref<8x32xf32, #tpu.memory_space<vmem>>, %arg4: memref<8x32xf32, #tpu.memory_space<vmem>>, %arg5: memref<1x8x256xf32, #tpu.memory_space<vmem>>, %arg6: memref<49x256xf32, #tpu.memory_space<vmem>>) attributes {dimension_semantics = [#tpu.dimension_semantics<parallel>], iteration_bounds = array<i64: 1>, scalar_prefetch = 0 : i64, scratch_operands = 1 : i64, tpu.core_type = #tpu.core_type<tc>, window_params = [{transform_indices = @transform_0, window_bounds = array<i64: 1, 8, 8, 37>}, {pipeline_mode = #tpu.pipeline_mode<synchronous>, transform_indices = @transform_1, window_bounds = array<i64: 8, 49>}, {pipeline_mode = #tpu.pipeline_mode<synchronous>, transform_indices = @transform_2, window_bounds = array<i64: 8, 32>}, {pipeline_mode = #tpu.pipeline_mode<synchronous>, transform_indices = @transform_3, window_bounds = array<i64: 8, 32>}, {transform_indices = @transform_4, window_bounds = array<i64: 1, 8, 256>}]} {
    %cst = arith.constant 1.000000e+00 : f32
    %0 = vector.broadcast %cst : f32 to vector<1x256xf32>
    %c48 = arith.constant 48 : index
    %c0 = arith.constant 0 : index
    %1 = vector.load %arg6[%c48, %c0] : memref<49x256xf32, #tpu.memory_space<vmem>>, vector<1x256xf32>
    tpu.vector_store %arg6[%c48, %c0], %0 {strides = array<i32>} : memref<49x256xf32, #tpu.memory_space<vmem>>, vector<1x256xf32>,
    %c0_0 = arith.constant 0 : index
    %c0_1 = arith.constant 0 : index
    %c0_2 = arith.constant 0 : index
    %c0_3 = arith.constant 0 : index
    %2 = vector.load %arg1[%c0_0, %c0_1, %c0_2, %c0_3] : memref<1x8x8x37xf32, #tpu.memory_space<vmem>>, vector<1x1x8x37xf32>
    %3 = vector.shape_cast %2 : vector<1x1x8x37xf32> to vector<8x37xf32>
    %4 = vector.extract_strided_slice %3 {offsets = [0, 0], sizes = [8, 32], strides = [1, 1]} : vector<8x37xf32> to vector<8x32xf32>
    %c0_4 = arith.constant 0 : index
    %c0_5 = arith.constant 0 : index
    %5 = vector.load %arg6[%c0_4, %c0_5] : memref<49x256xf32, #tpu.memory_space<vmem>>, vector<8x32xf32>
    tpu.vector_store %arg6[%c0_4, %c0_5], %4 {strides = array<i32>} : memref<49x256xf32, #tpu.memory_space<vmem>>, vector<8x32xf32>,
    %6 = vector.extract_strided_slice %3 {offsets = [0, 1], sizes = [8, 32], strides = [1, 1]} : vector<8x37xf32> to vector<8x32xf32>
    %c8 = arith.constant 8 : index
    %c0_6 = arith.constant 0 : index
    %7 = vector.load %arg6[%c8, %c0_6] : memref<49x256xf32, #tpu.memory_space<vmem>>, vector<8x32xf32>
    tpu.vector_store %arg6[%c8, %c0_6], %6 {strides = array<i32>} : memref<49x256xf32, #tpu.memory_space<vmem>>, vector<8x32xf32>,
    %8 = vector.extract_strided_slice %3 {offsets = [0, 2], sizes = [8, 32], strides = [1, 1]} : vector<8x37xf32> to vector<8x32xf32>
    %c16 = arith.constant 16 : index
    %c0_7 = arith.constant 0 : index
    %9 = vector.load %arg6[%c16, %c0_7] : memref<49x256xf32, #tpu.memory_space<vmem>>, vector<8x32xf32>
    tpu.vector_store %arg6[%c16, %c0_7], %8 {strides = array<i32>} : memref<49x256xf32, #tpu.memory_space<vmem>>, vector<8x32xf32>,
    %10 = vector.extract_strided_slice %3 {offsets = [0, 3], sizes = [8, 32], strides = [1, 1]} : vector<8x37xf32> to vector<8x32xf32>
    %c24 = arith.constant 24 : index
    %c0_8 = arith.constant 0 : index
    %11 = vector.load %arg6[%c24, %c0_8] : memref<49x256xf32, #tpu.memory_space<vmem>>, vector<8x32xf32>
    tpu.vector_store %arg6[%c24, %c0_8], %10 {strides = array<i32>} : memref<49x256xf32, #tpu.memory_space<vmem>>, vector<8x32xf32>,
    %12 = vector.extract_strided_slice %3 {offsets = [0, 4], sizes = [8, 32], strides = [1, 1]} : vector<8x37xf32> to vector<8x32xf32>
    %c32 = arith.constant 32 : index
    %c0_9 = arith.constant 0 : index
    %13 = vector.load %arg6[%c32, %c0_9] : memref<49x256xf32, #tpu.memory_space<vmem>>, vector<8x32xf32>
    tpu.vector_store %arg6[%c32, %c0_9], %12 {strides = array<i32>} : memref<49x256xf32, #tpu.memory_space<vmem>>, vector<8x32xf32>,
    %14 = vector.extract_strided_slice %3 {offsets = [0, 5], sizes = [8, 32], strides = [1, 1]} : vector<8x37xf32> to vector<8x32xf32>
    %c40 = arith.constant 40 : index
    %c0_10 = arith.constant 0 : index
    %15 = vector.load %arg6[%c40, %c0_10] : memref<49x256xf32, #tpu.memory_space<vmem>>, vector<8x32xf32>
    tpu.vector_store %arg6[%c40, %c0_10], %14 {strides = array<i32>} : memref<49x256xf32, #tpu.memory_space<vmem>>, vector<8x32xf32>,
    %c0_11 = arith.constant 0 : index
    %c1 = arith.constant 1 : index
    %c0_12 = arith.constant 0 : index
    %c0_13 = arith.constant 0 : index
    %16 = vector.load %arg1[%c0_11, %c1, %c0_12, %c0_13] : memref<1x8x8x37xf32, #tpu.memory_space<vmem>>, vector<1x1x8x37xf32>
    %17 = vector.shape_cast %16 : vector<1x1x8x37xf32> to vector<8x37xf32>
    %18 = vector.extract_strided_slice %17 {offsets = [0, 0], sizes = [8, 32], strides = [1, 1]} : vector<8x37xf32> to vector<8x32xf32>
    %c0_14 = arith.constant 0 : index
    %c32_15 = arith.constant 32 : index
    %19 = vector.load %arg6[%c0_14, %c32_15] : memref<49x256xf32, #tpu.memory_space<vmem>>, vector<8x32xf32>
    tpu.vector_store %arg6[%c0_14, %c32_15], %18 {strides = array<i32>} : memref<49x256xf32, #tpu.memory_space<vmem>>, vector<8x32xf32>,
    %20 = vector.extract_strided_slice %17 {offsets = [0, 1], sizes = [8, 32], strides = [1, 1]} : vector<8x37xf32> to vector<8x32xf32>
    %c8_16 = arith.constant 8 : index
    %c32_17 = arith.constant 32 : index
    %21 = vector.load %arg6[%c8_16, %c32_17] : memref<49x256xf32, #tpu.memory_space<vmem>>, vector<8x32xf32>
    tpu.vector_store %arg6[%c8_16, %c32_17], %20 {strides = array<i32>} : memref<49x256xf32, #tpu.memory_space<vmem>>, vector<8x32xf32>,
    %22 = vector.extract_strided_slice %17 {offsets = [0, 2], sizes = [8, 32], strides = [1, 1]} : vector<8x37xf32> to vector<8x32xf32>
    %c16_18 = arith.constant 16 : index
    %c32_19 = arith.constant 32 : index
    %23 = vector.load %arg6[%c16_18, %c32_19] : memref<49x256xf32, #tpu.memory_space<vmem>>, vector<8x32xf32>
    tpu.vector_store %arg6[%c16_18, %c32_19], %22 {strides = array<i32>} : memref<49x256xf32, #tpu.memory_space<vmem>>, vector<8x32xf32>,
    %24 = vector.extract_strided_slice %17 {offsets = [0, 3], sizes = [8, 32], strides = [1, 1]} : vector<8x37xf32> to vector<8x32xf32>
    %c24_20 = arith.constant 24 : index
    %c32_21 = arith.constant 32 : index
    %25 = vector.load %arg6[%c24_20, %c32_21] : memref<49x256xf32, #tpu.memory_space<vmem>>, vector<8x32xf32>
    tpu.vector_store %arg6[%c24_20, %c32_21], %24 {strides = array<i32>} : memref<49x256xf32, #tpu.memory_space<vmem>>, vector<8x32xf32>,
    %26 = vector.extract_strided_slice %17 {offsets = [0, 4], sizes = [8, 32], strides = [1, 1]} : vector<8x37xf32> to vector<8x32xf32>
    %c32_22 = arith.constant 32 : index
    %c32_23 = arith.constant 32 : index
    %27 = vector.load %arg6[%c32_22, %c32_23] : memref<49x256xf32, #tpu.memory_space<vmem>>, vector<8x32xf32>
    tpu.vector_store %arg6[%c32_22, %c32_23], %26 {strides = array<i32>} : memref<49x256xf32, #tpu.memory_space<vmem>>, vector<8x32xf32>,
    %28 = vector.extract_strided_slice %17 {offsets = [0, 5], sizes = [8, 32], strides = [1, 1]} : vector<8x37xf32> to vector<8x32xf32>
    %c40_24 = arith.constant 40 : index
    %c32_25 = arith.constant 32 : index
    %29 = vector.load %arg6[%c40_24, %c32_25] : memref<49x256xf32, #tpu.memory_space<vmem>>, vector<8x32xf32>
    tpu.vector_store %arg6[%c40_24, %c32_25], %28 {strides = array<i32>} : memref<49x256xf32, #tpu.memory_space<vmem>>, vector<8x32xf32>,
    %c0_26 = arith.constant 0 : index
    %c2 = arith.constant 2 : index
    %c0_27 = arith.constant 0 : index
    %c0_28 = arith.constant 0 : index
    %30 = vector.load %arg1[%c0_26, %c2, %c0_27, %c0_28] : memref<1x8x8x37xf32, #tpu.memory_space<vmem>>, vector<1x1x8x37xf32>
    %31 = vector.shape_cast %30 : vector<1x1x8x37xf32> to vector<8x37xf32>
    %32 = vector.extract_strided_slice %31 {offsets = [0, 0], sizes = [8, 32], strides = [1, 1]} : vector<8x37xf32> to vector<8x32xf32>
    %c0_29 = arith.constant 0 : index
    %c64 = arith.constant 64 : index
    %33 = vector.load %arg6[%c0_29, %c64] : memref<49x256xf32, #tpu.memory_space<vmem>>, vector<8x32xf32>
    tpu.vector_store %arg6[%c0_29, %c64], %32 {strides = array<i32>} : memref<49x256xf32, #tpu.memory_space<vmem>>, vector<8x32xf32>,
    %34 = vector.extract_strided_slice %31 {offsets = [0, 1], sizes = [8, 32], strides = [1, 1]} : vector<8x37xf32> to vector<8x32xf32>
    %c8_30 = arith.constant 8 : index
    %c64_31 = arith.constant 64 : index
    %35 = vector.load %arg6[%c8_30, %c64_31] : memref<49x256xf32, #tpu.memory_space<vmem>>, vector<8x32xf32>
    tpu.vector_store %arg6[%c8_30, %c64_31], %34 {strides = array<i32>} : memref<49x256xf32, #tpu.memory_space<vmem>>, vector<8x32xf32>,
    %36 = vector.extract_strided_slice %31 {offsets = [0, 2], sizes = [8, 32], strides = [1, 1]} : vector<8x37xf32> to vector<8x32xf32>
    %c16_32 = arith.constant 16 : index
    %c64_33 = arith.constant 64 : index
    %37 = vector.load %arg6[%c16_32, %c64_33] : memref<49x256xf32, #tpu.memory_space<vmem>>, vector<8x32xf32>
    tpu.vector_store %arg6[%c16_32, %c64_33], %36 {strides = array<i32>} : memref<49x256xf32, #tpu.memory_space<vmem>>, vector<8x32xf32>,
    %38 = vector.extract_strided_slice %31 {offsets = [0, 3], sizes = [8, 32], strides = [1, 1]} : vector<8x37xf32> to vector<8x32xf32>
    %c24_34 = arith.constant 24 : index
    %c64_35 = arith.constant 64 : index
    %39 = vector.load %arg6[%c24_34, %c64_35] : memref<49x256xf32, #tpu.memory_space<vmem>>, vector<8x32xf32>
    tpu.vector_store %arg6[%c24_34, %c64_35], %38 {strides = array<i32>} : memref<49x256xf32, #tpu.memory_space<vmem>>, vector<8x32xf32>,
    %40 = vector.extract_strided_slice %31 {offsets = [0, 4], sizes = [8, 32], strides = [1, 1]} : vector<8x37xf32> to vector<8x32xf32>
    %c32_36 = arith.constant 32 : index
    %c64_37 = arith.constant 64 : index
    %41 = vector.load %arg6[%c32_36, %c64_37] : memref<49x256xf32, #tpu.memory_space<vmem>>, vector<8x32xf32>
    tpu.vector_store %arg6[%c32_36, %c64_37], %40 {strides = array<i32>} : memref<49x256xf32, #tpu.memory_space<vmem>>, vector<8x32xf32>,
    %42 = vector.extract_strided_slice %31 {offsets = [0, 5], sizes = [8, 32], strides = [1, 1]} : vector<8x37xf32> to vector<8x32xf32>
    %c40_38 = arith.constant 40 : index
    %c64_39 = arith.constant 64 : index
    %43 = vector.load %arg6[%c40_38, %c64_39] : memref<49x256xf32, #tpu.memory_space<vmem>>, vector<8x32xf32>
    tpu.vector_store %arg6[%c40_38, %c64_39], %42 {strides = array<i32>} : memref<49x256xf32, #tpu.memory_space<vmem>>, vector<8x32xf32>,
    %c0_40 = arith.constant 0 : index
    %c3 = arith.constant 3 : index
    %c0_41 = arith.constant 0 : index
    %c0_42 = arith.constant 0 : index
    %44 = vector.load %arg1[%c0_40, %c3, %c0_41, %c0_42] : memref<1x8x8x37xf32, #tpu.memory_space<vmem>>, vector<1x1x8x37xf32>
    %45 = vector.shape_cast %44 : vector<1x1x8x37xf32> to vector<8x37xf32>
    %46 = vector.extract_strided_slice %45 {offsets = [0, 0], sizes = [8, 32], strides = [1, 1]} : vector<8x37xf32> to vector<8x32xf32>
    %c0_43 = arith.constant 0 : index
    %c96 = arith.constant 96 : index
    %47 = vector.load %arg6[%c0_43, %c96] : memref<49x256xf32, #tpu.memory_space<vmem>>, vector<8x32xf32>
    tpu.vector_store %arg6[%c0_43, %c96], %46 {strides = array<i32>} : memref<49x256xf32, #tpu.memory_space<vmem>>, vector<8x32xf32>,
    %48 = vector.extract_strided_slice %45 {offsets = [0, 1], sizes = [8, 32], strides = [1, 1]} : vector<8x37xf32> to vector<8x32xf32>
    %c8_44 = arith.constant 8 : index
    %c96_45 = arith.constant 96 : index
    %49 = vector.load %arg6[%c8_44, %c96_45] : memref<49x256xf32, #tpu.memory_space<vmem>>, vector<8x32xf32>
    tpu.vector_store %arg6[%c8_44, %c96_45], %48 {strides = array<i32>} : memref<49x256xf32, #tpu.memory_space<vmem>>, vector<8x32xf32>,
    %50 = vector.extract_strided_slice %45 {offsets = [0, 2], sizes = [8, 32], strides = [1, 1]} : vector<8x37xf32> to vector<8x32xf32>
    %c16_46 = arith.constant 16 : index
    %c96_47 = arith.constant 96 : index
    %51 = vector.load %arg6[%c16_46, %c96_47] : memref<49x256xf32, #tpu.memory_space<vmem>>, vector<8x32xf32>
    tpu.vector_store %arg6[%c16_46, %c96_47], %50 {strides = array<i32>} : memref<49x256xf32, #tpu.memory_space<vmem>>, vector<8x32xf32>,
    %52 = vector.extract_strided_slice %45 {offsets = [0, 3], sizes = [8, 32], strides = [1, 1]} : vector<8x37xf32> to vector<8x32xf32>
    %c24_48 = arith.constant 24 : index
    %c96_49 = arith.constant 96 : index
    %53 = vector.load %arg6[%c24_48, %c96_49] : memref<49x256xf32, #tpu.memory_space<vmem>>, vector<8x32xf32>
    tpu.vector_store %arg6[%c24_48, %c96_49], %52 {strides = array<i32>} : memref<49x256xf32, #tpu.memory_space<vmem>>, vector<8x32xf32>,
    %54 = vector.extract_strided_slice %45 {offsets = [0, 4], sizes = [8, 32], strides = [1, 1]} : vector<8x37xf32> to vector<8x32xf32>
    %c32_50 = arith.constant 32 : index
    %c96_51 = arith.constant 96 : index
    %55 = vector.load %arg6[%c32_50, %c96_51] : memref<49x256xf32, #tpu.memory_space<vmem>>, vector<8x32xf32>
    tpu.vector_store %arg6[%c32_50, %c96_51], %54 {strides = array<i32>} : memref<49x256xf32, #tpu.memory_space<vmem>>, vector<8x32xf32>,
    %56 = vector.extract_strided_slice %45 {offsets = [0, 5], sizes = [8, 32], strides = [1, 1]} : vector<8x37xf32> to vector<8x32xf32>
    %c40_52 = arith.constant 40 : index
    %c96_53 = arith.constant 96 : index
    %57 = vector.load %arg6[%c40_52, %c96_53] : memref<49x256xf32, #tpu.memory_space<vmem>>, vector<8x32xf32>
    tpu.vector_store %arg6[%c40_52, %c96_53], %56 {strides = array<i32>} : memref<49x256xf32, #tpu.memory_space<vmem>>, vector<8x32xf32>,
    %c0_54 = arith.constant 0 : index
    %c4 = arith.constant 4 : index
    %c0_55 = arith.constant 0 : index
    %c0_56 = arith.constant 0 : index
    %58 = vector.load %arg1[%c0_54, %c4, %c0_55, %c0_56] : memref<1x8x8x37xf32, #tpu.memory_space<vmem>>, vector<1x1x8x37xf32>
    %59 = vector.shape_cast %58 : vector<1x1x8x37xf32> to vector<8x37xf32>
    %60 = vector.extract_strided_slice %59 {offsets = [0, 0], sizes = [8, 32], strides = [1, 1]} : vector<8x37xf32> to vector<8x32xf32>
    %c0_57 = arith.constant 0 : index
    %c128 = arith.constant 128 : index
    %61 = vector.load %arg6[%c0_57, %c128] : memref<49x256xf32, #tpu.memory_space<vmem>>, vector<8x32xf32>
    tpu.vector_store %arg6[%c0_57, %c128], %60 {strides = array<i32>} : memref<49x256xf32, #tpu.memory_space<vmem>>, vector<8x32xf32>,
    %62 = vector.extract_strided_slice %59 {offsets = [0, 1], sizes = [8, 32], strides = [1, 1]} : vector<8x37xf32> to vector<8x32xf32>
    %c8_58 = arith.constant 8 : index
    %c128_59 = arith.constant 128 : index
    %63 = vector.load %arg6[%c8_58, %c128_59] : memref<49x256xf32, #tpu.memory_space<vmem>>, vector<8x32xf32>
    tpu.vector_store %arg6[%c8_58, %c128_59], %62 {strides = array<i32>} : memref<49x256xf32, #tpu.memory_space<vmem>>, vector<8x32xf32>,
    %64 = vector.extract_strided_slice %59 {offsets = [0, 2], sizes = [8, 32], strides = [1, 1]} : vector<8x37xf32> to vector<8x32xf32>
    %c16_60 = arith.constant 16 : index
    %c128_61 = arith.constant 128 : index
    %65 = vector.load %arg6[%c16_60, %c128_61] : memref<49x256xf32, #tpu.memory_space<vmem>>, vector<8x32xf32>
    tpu.vector_store %arg6[%c16_60, %c128_61], %64 {strides = array<i32>} : memref<49x256xf32, #tpu.memory_space<vmem>>, vector<8x32xf32>,
    %66 = vector.extract_strided_slice %59 {offsets = [0, 3], sizes = [8, 32], strides = [1, 1]} : vector<8x37xf32> to vector<8x32xf32>
    %c24_62 = arith.constant 24 : index
    %c128_63 = arith.constant 128 : index
    %67 = vector.load %arg6[%c24_62, %c128_63] : memref<49x256xf32, #tpu.memory_space<vmem>>, vector<8x32xf32>
    tpu.vector_store %arg6[%c24_62, %c128_63], %66 {strides = array<i32>} : memref<49x256xf32, #tpu.memory_space<vmem>>, vector<8x32xf32>,
    %68 = vector.extract_strided_slice %59 {offsets = [0, 4], sizes = [8, 32], strides = [1, 1]} : vector<8x37xf32> to vector<8x32xf32>
    %c32_64 = arith.constant 32 : index
    %c128_65 = arith.constant 128 : index
    %69 = vector.load %arg6[%c32_64, %c128_65] : memref<49x256xf32, #tpu.memory_space<vmem>>, vector<8x32xf32>
    tpu.vector_store %arg6[%c32_64, %c128_65], %68 {strides = array<i32>} : memref<49x256xf32, #tpu.memory_space<vmem>>, vector<8x32xf32>,
    %70 = vector.extract_strided_slice %59 {offsets = [0, 5], sizes = [8, 32], strides = [1, 1]} : vector<8x37xf32> to vector<8x32xf32>
    %c40_66 = arith.constant 40 : index
    %c128_67 = arith.constant 128 : index
    %71 = vector.load %arg6[%c40_66, %c128_67] : memref<49x256xf32, #tpu.memory_space<vmem>>, vector<8x32xf32>
    tpu.vector_store %arg6[%c40_66, %c128_67], %70 {strides = array<i32>} : memref<49x256xf32, #tpu.memory_space<vmem>>, vector<8x32xf32>,
    %c0_68 = arith.constant 0 : index
    %c5 = arith.constant 5 : index
    %c0_69 = arith.constant 0 : index
    %c0_70 = arith.constant 0 : index
    %72 = vector.load %arg1[%c0_68, %c5, %c0_69, %c0_70] : memref<1x8x8x37xf32, #tpu.memory_space<vmem>>, vector<1x1x8x37xf32>
    %73 = vector.shape_cast %72 : vector<1x1x8x37xf32> to vector<8x37xf32>
    %74 = vector.extract_strided_slice %73 {offsets = [0, 0], sizes = [8, 32], strides = [1, 1]} : vector<8x37xf32> to vector<8x32xf32>
    %c0_71 = arith.constant 0 : index
    %c160 = arith.constant 160 : index
    %75 = vector.load %arg6[%c0_71, %c160] : memref<49x256xf32, #tpu.memory_space<vmem>>, vector<8x32xf32>
    tpu.vector_store %arg6[%c0_71, %c160], %74 {strides = array<i32>} : memref<49x256xf32, #tpu.memory_space<vmem>>, vector<8x32xf32>,
    %76 = vector.extract_strided_slice %73 {offsets = [0, 1], sizes = [8, 32], strides = [1, 1]} : vector<8x37xf32> to vector<8x32xf32>
    %c8_72 = arith.constant 8 : index
    %c160_73 = arith.constant 160 : index
    %77 = vector.load %arg6[%c8_72, %c160_73] : memref<49x256xf32, #tpu.memory_space<vmem>>, vector<8x32xf32>
    tpu.vector_store %arg6[%c8_72, %c160_73], %76 {strides = array<i32>} : memref<49x256xf32, #tpu.memory_space<vmem>>, vector<8x32xf32>,
    %78 = vector.extract_strided_slice %73 {offsets = [0, 2], sizes = [8, 32], strides = [1, 1]} : vector<8x37xf32> to vector<8x32xf32>
    %c16_74 = arith.constant 16 : index
    %c160_75 = arith.constant 160 : index
    %79 = vector.load %arg6[%c16_74, %c160_75] : memref<49x256xf32, #tpu.memory_space<vmem>>, vector<8x32xf32>
    tpu.vector_store %arg6[%c16_74, %c160_75], %78 {strides = array<i32>} : memref<49x256xf32, #tpu.memory_space<vmem>>, vector<8x32xf32>,
    %80 = vector.extract_strided_slice %73 {offsets = [0, 3], sizes = [8, 32], strides = [1, 1]} : vector<8x37xf32> to vector<8x32xf32>
    %c24_76 = arith.constant 24 : index
    %c160_77 = arith.constant 160 : index
    %81 = vector.load %arg6[%c24_76, %c160_77] : memref<49x256xf32, #tpu.memory_space<vmem>>, vector<8x32xf32>
    tpu.vector_store %arg6[%c24_76, %c160_77], %80 {strides = array<i32>} : memref<49x256xf32, #tpu.memory_space<vmem>>, vector<8x32xf32>,
    %82 = vector.extract_strided_slice %73 {offsets = [0, 4], sizes = [8, 32], strides = [1, 1]} : vector<8x37xf32> to vector<8x32xf32>
    %c32_78 = arith.constant 32 : index
    %c160_79 = arith.constant 160 : index
    %83 = vector.load %arg6[%c32_78, %c160_79] : memref<49x256xf32, #tpu.memory_space<vmem>>, vector<8x32xf32>
    tpu.vector_store %arg6[%c32_78, %c160_79], %82 {strides = array<i32>} : memref<49x256xf32, #tpu.memory_space<vmem>>, vector<8x32xf32>,
    %84 = vector.extract_strided_slice %73 {offsets = [0, 5], sizes = [8, 32], strides = [1, 1]} : vector<8x37xf32> to vector<8x32xf32>
    %c40_80 = arith.constant 40 : index
    %c160_81 = arith.constant 160 : index
    %85 = vector.load %arg6[%c40_80, %c160_81] : memref<49x256xf32, #tpu.memory_space<vmem>>, vector<8x32xf32>
    tpu.vector_store %arg6[%c40_80, %c160_81], %84 {strides = array<i32>} : memref<49x256xf32, #tpu.memory_space<vmem>>, vector<8x32xf32>,
    %c0_82 = arith.constant 0 : index
    %c6 = arith.constant 6 : index
    %c0_83 = arith.constant 0 : index
    %c0_84 = arith.constant 0 : index
    %86 = vector.load %arg1[%c0_82, %c6, %c0_83, %c0_84] : memref<1x8x8x37xf32, #tpu.memory_space<vmem>>, vector<1x1x8x37xf32>
    %87 = vector.shape_cast %86 : vector<1x1x8x37xf32> to vector<8x37xf32>
    %88 = vector.extract_strided_slice %87 {offsets = [0, 0], sizes = [8, 32], strides = [1, 1]} : vector<8x37xf32> to vector<8x32xf32>
    %c0_85 = arith.constant 0 : index
    %c192 = arith.constant 192 : index
    %89 = vector.load %arg6[%c0_85, %c192] : memref<49x256xf32, #tpu.memory_space<vmem>>, vector<8x32xf32>
    tpu.vector_store %arg6[%c0_85, %c192], %88 {strides = array<i32>} : memref<49x256xf32, #tpu.memory_space<vmem>>, vector<8x32xf32>,
    %90 = vector.extract_strided_slice %87 {offsets = [0, 1], sizes = [8, 32], strides = [1, 1]} : vector<8x37xf32> to vector<8x32xf32>
    %c8_86 = arith.constant 8 : index
    %c192_87 = arith.constant 192 : index
    %91 = vector.load %arg6[%c8_86, %c192_87] : memref<49x256xf32, #tpu.memory_space<vmem>>, vector<8x32xf32>
    tpu.vector_store %arg6[%c8_86, %c192_87], %90 {strides = array<i32>} : memref<49x256xf32, #tpu.memory_space<vmem>>, vector<8x32xf32>,
    %92 = vector.extract_strided_slice %87 {offsets = [0, 2], sizes = [8, 32], strides = [1, 1]} : vector<8x37xf32> to vector<8x32xf32>
    %c16_88 = arith.constant 16 : index
    %c192_89 = arith.constant 192 : index
    %93 = vector.load %arg6[%c16_88, %c192_89] : memref<49x256xf32, #tpu.memory_space<vmem>>, vector<8x32xf32>
    tpu.vector_store %arg6[%c16_88, %c192_89], %92 {strides = array<i32>} : memref<49x256xf32, #tpu.memory_space<vmem>>, vector<8x32xf32>,
    %94 = vector.extract_strided_slice %87 {offsets = [0, 3], sizes = [8, 32], strides = [1, 1]} : vector<8x37xf32> to vector<8x32xf32>
    %c24_90 = arith.constant 24 : index
    %c192_91 = arith.constant 192 : index
    %95 = vector.load %arg6[%c24_90, %c192_91] : memref<49x256xf32, #tpu.memory_space<vmem>>, vector<8x32xf32>
    tpu.vector_store %arg6[%c24_90, %c192_91], %94 {strides = array<i32>} : memref<49x256xf32, #tpu.memory_space<vmem>>, vector<8x32xf32>,
    %96 = vector.extract_strided_slice %87 {offsets = [0, 4], sizes = [8, 32], strides = [1, 1]} : vector<8x37xf32> to vector<8x32xf32>
    %c32_92 = arith.constant 32 : index
    %c192_93 = arith.constant 192 : index
    %97 = vector.load %arg6[%c32_92, %c192_93] : memref<49x256xf32, #tpu.memory_space<vmem>>, vector<8x32xf32>
    tpu.vector_store %arg6[%c32_92, %c192_93], %96 {strides = array<i32>} : memref<49x256xf32, #tpu.memory_space<vmem>>, vector<8x32xf32>,
    %98 = vector.extract_strided_slice %87 {offsets = [0, 5], sizes = [8, 32], strides = [1, 1]} : vector<8x37xf32> to vector<8x32xf32>
    %c40_94 = arith.constant 40 : index
    %c192_95 = arith.constant 192 : index
    %99 = vector.load %arg6[%c40_94, %c192_95] : memref<49x256xf32, #tpu.memory_space<vmem>>, vector<8x32xf32>
    tpu.vector_store %arg6[%c40_94, %c192_95], %98 {strides = array<i32>} : memref<49x256xf32, #tpu.memory_space<vmem>>, vector<8x32xf32>,
    %c0_96 = arith.constant 0 : index
    %c7 = arith.constant 7 : index
    %c0_97 = arith.constant 0 : index
    %c0_98 = arith.constant 0 : index
    %100 = vector.load %arg1[%c0_96, %c7, %c0_97, %c0_98] : memref<1x8x8x37xf32, #tpu.memory_space<vmem>>, vector<1x1x8x37xf32>
    %101 = vector.shape_cast %100 : vector<1x1x8x37xf32> to vector<8x37xf32>
    %102 = vector.extract_strided_slice %101 {offsets = [0, 0], sizes = [8, 32], strides = [1, 1]} : vector<8x37xf32> to vector<8x32xf32>
    %c0_99 = arith.constant 0 : index
    %c224 = arith.constant 224 : index
    %103 = vector.load %arg6[%c0_99, %c224] : memref<49x256xf32, #tpu.memory_space<vmem>>, vector<8x32xf32>
    tpu.vector_store %arg6[%c0_99, %c224], %102 {strides = array<i32>} : memref<49x256xf32, #tpu.memory_space<vmem>>, vector<8x32xf32>,
    %104 = vector.extract_strided_slice %101 {offsets = [0, 1], sizes = [8, 32], strides = [1, 1]} : vector<8x37xf32> to vector<8x32xf32>
    %c8_100 = arith.constant 8 : index
    %c224_101 = arith.constant 224 : index
    %105 = vector.load %arg6[%c8_100, %c224_101] : memref<49x256xf32, #tpu.memory_space<vmem>>, vector<8x32xf32>
    tpu.vector_store %arg6[%c8_100, %c224_101], %104 {strides = array<i32>} : memref<49x256xf32, #tpu.memory_space<vmem>>, vector<8x32xf32>,
    %106 = vector.extract_strided_slice %101 {offsets = [0, 2], sizes = [8, 32], strides = [1, 1]} : vector<8x37xf32> to vector<8x32xf32>
    %c16_102 = arith.constant 16 : index
    %c224_103 = arith.constant 224 : index
    %107 = vector.load %arg6[%c16_102, %c224_103] : memref<49x256xf32, #tpu.memory_space<vmem>>, vector<8x32xf32>
    tpu.vector_store %arg6[%c16_102, %c224_103], %106 {strides = array<i32>} : memref<49x256xf32, #tpu.memory_space<vmem>>, vector<8x32xf32>,
    %108 = vector.extract_strided_slice %101 {offsets = [0, 3], sizes = [8, 32], strides = [1, 1]} : vector<8x37xf32> to vector<8x32xf32>
    %c24_104 = arith.constant 24 : index
    %c224_105 = arith.constant 224 : index
    %109 = vector.load %arg6[%c24_104, %c224_105] : memref<49x256xf32, #tpu.memory_space<vmem>>, vector<8x32xf32>
    tpu.vector_store %arg6[%c24_104, %c224_105], %108 {strides = array<i32>} : memref<49x256xf32, #tpu.memory_space<vmem>>, vector<8x32xf32>,
    %110 = vector.extract_strided_slice %101 {offsets = [0, 4], sizes = [8, 32], strides = [1, 1]} : vector<8x37xf32> to vector<8x32xf32>
    %c32_106 = arith.constant 32 : index
    %c224_107 = arith.constant 224 : index
    %111 = vector.load %arg6[%c32_106, %c224_107] : memref<49x256xf32, #tpu.memory_space<vmem>>, vector<8x32xf32>
    tpu.vector_store %arg6[%c32_106, %c224_107], %110 {strides = array<i32>} : memref<49x256xf32, #tpu.memory_space<vmem>>, vector<8x32xf32>,
    %112 = vector.extract_strided_slice %101 {offsets = [0, 5], sizes = [8, 32], strides = [1, 1]} : vector<8x37xf32> to vector<8x32xf32>
    %c40_108 = arith.constant 40 : index
    %c224_109 = arith.constant 224 : index
    %113 = vector.load %arg6[%c40_108, %c224_109] : memref<49x256xf32, #tpu.memory_space<vmem>>, vector<8x32xf32>
    tpu.vector_store %arg6[%c40_108, %c224_109], %112 {strides = array<i32>} : memref<49x256xf32, #tpu.memory_space<vmem>>, vector<8x32xf32>,
    %c0_110 = arith.constant 0 : index
    %c0_111 = arith.constant 0 : index
    %114 = vector.load %arg2[%c0_110, %c0_111] : memref<8x49xf32, #tpu.memory_space<vmem>>, vector<8x49xf32>
    %c0_112 = arith.constant 0 : index
    %c0_113 = arith.constant 0 : index
    %115 = vector.load %arg6[%c0_112, %c0_113] : memref<49x256xf32, #tpu.memory_space<vmem>>, vector<49x256xf32>
    %cst_114 = arith.constant dense<0.000000e+00> : vector<8x256xf32>
    %116 = tpu.matmul %114, %115, %cst_114 {dimension_numbers = #tpu.dot_dimension_numbers<[1], [0], [0], [1], [0, 0, 1, 1], [], []>} : vector<8x49xf32>, vector<49x256xf32>, vector<8x256xf32> -> vector<8x256xf32>
    %117 = tpu.iota {dimensions = array<i32: 1>} : vector<1x256xi32>
    %cst_115 = arith.constant dense<0.000000e+00> : vector<256xf32>
    %118 = vector.multi_reduction <add>, %116, %cst_115 [0] : vector<8x256xf32> to vector<256xf32>
    %119 = vector.shape_cast %118 : vector<256xf32> to vector<1x256xf32>
    %cst_116 = arith.constant 0.000000e+00 : f32
    %120 = vector.broadcast %cst_116 : f32 to vector<1x256xf32>
    %121 = vector.extract_strided_slice %119 {offsets = [0, 0], sizes = [1, 32], strides = [1, 1]} : vector<1x256xf32> to vector<1x32xf32>
    %122 = vector.shape_cast %121 : vector<1x32xf32> to vector<1x1x32xf32>
    %cst_117 = arith.constant dense<0.000000e+00> : vector<1xf32>
    %123 = vector.multi_reduction <add>, %122, %cst_117 [1, 2] : vector<1x1x32xf32> to vector<1xf32>
    %124 = vector.shape_cast %123 : vector<1xf32> to vector<1x1x1xf32>
    %125 = vector.extract %124[0, 0, 0] : f32 from vector<1x1x1xf32>
    %cst_118 = arith.constant 3.906250e-03 : f32
    %126 = arith.mulf %125, %cst_118 : f32
    %c0_i32 = arith.constant 0 : i32
    %127 = vector.broadcast %c0_i32 : i32 to vector<1x256xi32>
    %128 = arith.cmpi sge, %117, %127 : vector<1x256xi32>
    %c32_i32 = arith.constant 32 : i32
    %129 = vector.broadcast %c32_i32 : i32 to vector<1x256xi32>
    %130 = arith.cmpi slt, %117, %129 : vector<1x256xi32>
    %131 = arith.andi %128, %130 : vector<1x256xi1>
    %132 = vector.broadcast %126 : f32 to vector<1x256xf32>
    %133 = arith.select %131, %132, %120 : vector<1x256xi1>, vector<1x256xf32>
    %134 = vector.extract_strided_slice %119 {offsets = [0, 32], sizes = [1, 32], strides = [1, 1]} : vector<1x256xf32> to vector<1x32xf32>
    %135 = vector.shape_cast %134 : vector<1x32xf32> to vector<1x1x32xf32>
    %cst_119 = arith.constant dense<0.000000e+00> : vector<1xf32>
    %136 = vector.multi_reduction <add>, %135, %cst_119 [1, 2] : vector<1x1x32xf32> to vector<1xf32>
    %137 = vector.shape_cast %136 : vector<1xf32> to vector<1x1x1xf32>
    %138 = vector.extract %137[0, 0, 0] : f32 from vector<1x1x1xf32>
    %cst_120 = arith.constant 3.906250e-03 : f32
    %139 = arith.mulf %138, %cst_120 : f32
    %c32_i32_121 = arith.constant 32 : i32
    %140 = vector.broadcast %c32_i32_121 : i32 to vector<1x256xi32>
    %141 = arith.cmpi sge, %117, %140 : vector<1x256xi32>
    %c64_i32 = arith.constant 64 : i32
    %142 = vector.broadcast %c64_i32 : i32 to vector<1x256xi32>
    %143 = arith.cmpi slt, %117, %142 : vector<1x256xi32>
    %144 = arith.andi %141, %143 : vector<1x256xi1>
    %145 = vector.broadcast %139 : f32 to vector<1x256xf32>
    %146 = arith.select %144, %145, %133 : vector<1x256xi1>, vector<1x256xf32>
    %147 = vector.extract_strided_slice %119 {offsets = [0, 64], sizes = [1, 32], strides = [1, 1]} : vector<1x256xf32> to vector<1x32xf32>
    %148 = vector.shape_cast %147 : vector<1x32xf32> to vector<1x1x32xf32>
    %cst_122 = arith.constant dense<0.000000e+00> : vector<1xf32>
    %149 = vector.multi_reduction <add>, %148, %cst_122 [1, 2] : vector<1x1x32xf32> to vector<1xf32>
    %150 = vector.shape_cast %149 : vector<1xf32> to vector<1x1x1xf32>
    %151 = vector.extract %150[0, 0, 0] : f32 from vector<1x1x1xf32>
    %cst_123 = arith.constant 3.906250e-03 : f32
    %152 = arith.mulf %151, %cst_123 : f32
    %c64_i32_124 = arith.constant 64 : i32
    %153 = vector.broadcast %c64_i32_124 : i32 to vector<1x256xi32>
    %154 = arith.cmpi sge, %117, %153 : vector<1x256xi32>
    %c96_i32 = arith.constant 96 : i32
    %155 = vector.broadcast %c96_i32 : i32 to vector<1x256xi32>
    %156 = arith.cmpi slt, %117, %155 : vector<1x256xi32>
    %157 = arith.andi %154, %156 : vector<1x256xi1>
    %158 = vector.broadcast %152 : f32 to vector<1x256xf32>
    %159 = arith.select %157, %158, %146 : vector<1x256xi1>, vector<1x256xf32>
    %160 = vector.extract_strided_slice %119 {offsets = [0, 96], sizes = [1, 32], strides = [1, 1]} : vector<1x256xf32> to vector<1x32xf32>
    %161 = vector.shape_cast %160 : vector<1x32xf32> to vector<1x1x32xf32>
    %cst_125 = arith.constant dense<0.000000e+00> : vector<1xf32>
    %162 = vector.multi_reduction <add>, %161, %cst_125 [1, 2] : vector<1x1x32xf32> to vector<1xf32>
    %163 = vector.shape_cast %162 : vector<1xf32> to vector<1x1x1xf32>
    %164 = vector.extract %163[0, 0, 0] : f32 from vector<1x1x1xf32>
    %cst_126 = arith.constant 3.906250e-03 : f32
    %165 = arith.mulf %164, %cst_126 : f32
    %c96_i32_127 = arith.constant 96 : i32
    %166 = vector.broadcast %c96_i32_127 : i32 to vector<1x256xi32>
    %167 = arith.cmpi sge, %117, %166 : vector<1x256xi32>
    %c128_i32 = arith.constant 128 : i32
    %168 = vector.broadcast %c128_i32 : i32 to vector<1x256xi32>
    %169 = arith.cmpi slt, %117, %168 : vector<1x256xi32>
    %170 = arith.andi %167, %169 : vector<1x256xi1>
    %171 = vector.broadcast %165 : f32 to vector<1x256xf32>
    %172 = arith.select %170, %171, %159 : vector<1x256xi1>, vector<1x256xf32>
    %173 = vector.extract_strided_slice %119 {offsets = [0, 128], sizes = [1, 32], strides = [1, 1]} : vector<1x256xf32> to vector<1x32xf32>
    %174 = vector.shape_cast %173 : vector<1x32xf32> to vector<1x1x32xf32>
    %cst_128 = arith.constant dense<0.000000e+00> : vector<1xf32>
    %175 = vector.multi_reduction <add>, %174, %cst_128 [1, 2] : vector<1x1x32xf32> to vector<1xf32>
    %176 = vector.shape_cast %175 : vector<1xf32> to vector<1x1x1xf32>
    %177 = vector.extract %176[0, 0, 0] : f32 from vector<1x1x1xf32>
    %cst_129 = arith.constant 3.906250e-03 : f32
    %178 = arith.mulf %177, %cst_129 : f32
    %c128_i32_130 = arith.constant 128 : i32
    %179 = vector.broadcast %c128_i32_130 : i32 to vector<1x256xi32>
    %180 = arith.cmpi sge, %117, %179 : vector<1x256xi32>
    %c160_i32 = arith.constant 160 : i32
    %181 = vector.broadcast %c160_i32 : i32 to vector<1x256xi32>
    %182 = arith.cmpi slt, %117, %181 : vector<1x256xi32>
    %183 = arith.andi %180, %182 : vector<1x256xi1>
    %184 = vector.broadcast %178 : f32 to vector<1x256xf32>
    %185 = arith.select %183, %184, %172 : vector<1x256xi1>, vector<1x256xf32>
    %186 = vector.extract_strided_slice %119 {offsets = [0, 160], sizes = [1, 32], strides = [1, 1]} : vector<1x256xf32> to vector<1x32xf32>
    %187 = vector.shape_cast %186 : vector<1x32xf32> to vector<1x1x32xf32>
    %cst_131 = arith.constant dense<0.000000e+00> : vector<1xf32>
    %188 = vector.multi_reduction <add>, %187, %cst_131 [1, 2] : vector<1x1x32xf32> to vector<1xf32>
    %189 = vector.shape_cast %188 : vector<1xf32> to vector<1x1x1xf32>
    %190 = vector.extract %189[0, 0, 0] : f32 from vector<1x1x1xf32>
    %cst_132 = arith.constant 3.906250e-03 : f32
    %191 = arith.mulf %190, %cst_132 : f32
    %c160_i32_133 = arith.constant 160 : i32
    %192 = vector.broadcast %c160_i32_133 : i32 to vector<1x256xi32>
    %193 = arith.cmpi sge, %117, %192 : vector<1x256xi32>
    %c192_i32 = arith.constant 192 : i32
    %194 = vector.broadcast %c192_i32 : i32 to vector<1x256xi32>
    %195 = arith.cmpi slt, %117, %194 : vector<1x256xi32>
    %196 = arith.andi %193, %195 : vector<1x256xi1>
    %197 = vector.broadcast %191 : f32 to vector<1x256xf32>
    %198 = arith.select %196, %197, %185 : vector<1x256xi1>, vector<1x256xf32>
    %199 = vector.extract_strided_slice %119 {offsets = [0, 192], sizes = [1, 32], strides = [1, 1]} : vector<1x256xf32> to vector<1x32xf32>
    %200 = vector.shape_cast %199 : vector<1x32xf32> to vector<1x1x32xf32>
    %cst_134 = arith.constant dense<0.000000e+00> : vector<1xf32>
    %201 = vector.multi_reduction <add>, %200, %cst_134 [1, 2] : vector<1x1x32xf32> to vector<1xf32>
    %202 = vector.shape_cast %201 : vector<1xf32> to vector<1x1x1xf32>
    %203 = vector.extract %202[0, 0, 0] : f32 from vector<1x1x1xf32>
    %cst_135 = arith.constant 3.906250e-03 : f32
    %204 = arith.mulf %203, %cst_135 : f32
    %c192_i32_136 = arith.constant 192 : i32
    %205 = vector.broadcast %c192_i32_136 : i32 to vector<1x256xi32>
    %206 = arith.cmpi sge, %117, %205 : vector<1x256xi32>
    %c224_i32 = arith.constant 224 : i32
    %207 = vector.broadcast %c224_i32 : i32 to vector<1x256xi32>
    %208 = arith.cmpi slt, %117, %207 : vector<1x256xi32>
    %209 = arith.andi %206, %208 : vector<1x256xi1>
    %210 = vector.broadcast %204 : f32 to vector<1x256xf32>
    %211 = arith.select %209, %210, %198 : vector<1x256xi1>, vector<1x256xf32>
    %212 = vector.extract_strided_slice %119 {offsets = [0, 224], sizes = [1, 32], strides = [1, 1]} : vector<1x256xf32> to vector<1x32xf32>
    %213 = vector.shape_cast %212 : vector<1x32xf32> to vector<1x1x32xf32>
    %cst_137 = arith.constant dense<0.000000e+00> : vector<1xf32>
    %214 = vector.multi_reduction <add>, %213, %cst_137 [1, 2] : vector<1x1x32xf32> to vector<1xf32>
    %215 = vector.shape_cast %214 : vector<1xf32> to vector<1x1x1xf32>
    %216 = vector.extract %215[0, 0, 0] : f32 from vector<1x1x1xf32>
    %cst_138 = arith.constant 3.906250e-03 : f32
    %217 = arith.mulf %216, %cst_138 : f32
    %c224_i32_139 = arith.constant 224 : i32
    %218 = vector.broadcast %c224_i32_139 : i32 to vector<1x256xi32>
    %219 = arith.cmpi sge, %117, %218 : vector<1x256xi32>
    %c256_i32 = arith.constant 256 : i32
    %220 = vector.broadcast %c256_i32 : i32 to vector<1x256xi32>
    %221 = arith.cmpi slt, %117, %220 : vector<1x256xi32>
    %222 = arith.andi %219, %221 : vector<1x256xi1>
    %223 = vector.broadcast %217 : f32 to vector<1x256xf32>
    %224 = arith.select %222, %223, %211 : vector<1x256xi1>, vector<1x256xf32>
    %225 = vector.broadcast %224 : vector<1x256xf32> to vector<8x256xf32>
    %226 = arith.subf %116, %225 : vector<8x256xf32>
    %227 = arith.mulf %226, %226 : vector<8x256xf32>
    %cst_140 = arith.constant dense<0.000000e+00> : vector<256xf32>
    %228 = vector.multi_reduction <add>, %227, %cst_140 [0] : vector<8x256xf32> to vector<256xf32>
    %229 = vector.shape_cast %228 : vector<256xf32> to vector<1x256xf32>
    %cst_141 = arith.constant 0.000000e+00 : f32
    %230 = vector.broadcast %cst_141 : f32 to vector<1x256xf32>
    %231 = vector.extract_strided_slice %229 {offsets = [0, 0], sizes = [1, 32], strides = [1, 1]} : vector<1x256xf32> to vector<1x32xf32>
    %232 = vector.shape_cast %231 : vector<1x32xf32> to vector<1x1x32xf32>
    %cst_142 = arith.constant dense<0.000000e+00> : vector<1xf32>
    %233 = vector.multi_reduction <add>, %232, %cst_142 [1, 2] : vector<1x1x32xf32> to vector<1xf32>
    %234 = vector.shape_cast %233 : vector<1xf32> to vector<1x1x1xf32>
    %235 = vector.extract %234[0, 0, 0] : f32 from vector<1x1x1xf32>
    %cst_143 = arith.constant 3.906250e-03 : f32
    %236 = arith.mulf %235, %cst_143 : f32
    %c0_i32_144 = arith.constant 0 : i32
    %237 = vector.broadcast %c0_i32_144 : i32 to vector<1x256xi32>
    %238 = arith.cmpi sge, %117, %237 : vector<1x256xi32>
    %c32_i32_145 = arith.constant 32 : i32
    %239 = vector.broadcast %c32_i32_145 : i32 to vector<1x256xi32>
    %240 = arith.cmpi slt, %117, %239 : vector<1x256xi32>
    %241 = arith.andi %238, %240 : vector<1x256xi1>
    %cst_146 = arith.constant 9.99999974E-6 : f32
    %242 = arith.addf %236, %cst_146 : f32
    %243 = math.rsqrt %242 : f32
    %244 = vector.broadcast %243 : f32 to vector<1x256xf32>
    %245 = arith.select %241, %244, %230 : vector<1x256xi1>, vector<1x256xf32>
    %246 = vector.extract_strided_slice %229 {offsets = [0, 32], sizes = [1, 32], strides = [1, 1]} : vector<1x256xf32> to vector<1x32xf32>
    %247 = vector.shape_cast %246 : vector<1x32xf32> to vector<1x1x32xf32>
    %cst_147 = arith.constant dense<0.000000e+00> : vector<1xf32>
    %248 = vector.multi_reduction <add>, %247, %cst_147 [1, 2] : vector<1x1x32xf32> to vector<1xf32>
    %249 = vector.shape_cast %248 : vector<1xf32> to vector<1x1x1xf32>
    %250 = vector.extract %249[0, 0, 0] : f32 from vector<1x1x1xf32>
    %cst_148 = arith.constant 3.906250e-03 : f32
    %251 = arith.mulf %250, %cst_148 : f32
    %c32_i32_149 = arith.constant 32 : i32
    %252 = vector.broadcast %c32_i32_149 : i32 to vector<1x256xi32>
    %253 = arith.cmpi sge, %117, %252 : vector<1x256xi32>
    %c64_i32_150 = arith.constant 64 : i32
    %254 = vector.broadcast %c64_i32_150 : i32 to vector<1x256xi32>
    %255 = arith.cmpi slt, %117, %254 : vector<1x256xi32>
    %256 = arith.andi %253, %255 : vector<1x256xi1>
    %cst_151 = arith.constant 9.99999974E-6 : f32
    %257 = arith.addf %251, %cst_151 : f32
    %258 = math.rsqrt %257 : f32
    %259 = vector.broadcast %258 : f32 to vector<1x256xf32>
    %260 = arith.select %256, %259, %245 : vector<1x256xi1>, vector<1x256xf32>
    %261 = vector.extract_strided_slice %229 {offsets = [0, 64], sizes = [1, 32], strides = [1, 1]} : vector<1x256xf32> to vector<1x32xf32>
    %262 = vector.shape_cast %261 : vector<1x32xf32> to vector<1x1x32xf32>
    %cst_152 = arith.constant dense<0.000000e+00> : vector<1xf32>
    %263 = vector.multi_reduction <add>, %262, %cst_152 [1, 2] : vector<1x1x32xf32> to vector<1xf32>
    %264 = vector.shape_cast %263 : vector<1xf32> to vector<1x1x1xf32>
    %265 = vector.extract %264[0, 0, 0] : f32 from vector<1x1x1xf32>
    %cst_153 = arith.constant 3.906250e-03 : f32
    %266 = arith.mulf %265, %cst_153 : f32
    %c64_i32_154 = arith.constant 64 : i32
    %267 = vector.broadcast %c64_i32_154 : i32 to vector<1x256xi32>
    %268 = arith.cmpi sge, %117, %267 : vector<1x256xi32>
    %c96_i32_155 = arith.constant 96 : i32
    %269 = vector.broadcast %c96_i32_155 : i32 to vector<1x256xi32>
    %270 = arith.cmpi slt, %117, %269 : vector<1x256xi32>
    %271 = arith.andi %268, %270 : vector<1x256xi1>
    %cst_156 = arith.constant 9.99999974E-6 : f32
    %272 = arith.addf %266, %cst_156 : f32
    %273 = math.rsqrt %272 : f32
    %274 = vector.broadcast %273 : f32 to vector<1x256xf32>
    %275 = arith.select %271, %274, %260 : vector<1x256xi1>, vector<1x256xf32>
    %276 = vector.extract_strided_slice %229 {offsets = [0, 96], sizes = [1, 32], strides = [1, 1]} : vector<1x256xf32> to vector<1x32xf32>
    %277 = vector.shape_cast %276 : vector<1x32xf32> to vector<1x1x32xf32>
    %cst_157 = arith.constant dense<0.000000e+00> : vector<1xf32>
    %278 = vector.multi_reduction <add>, %277, %cst_157 [1, 2] : vector<1x1x32xf32> to vector<1xf32>
    %279 = vector.shape_cast %278 : vector<1xf32> to vector<1x1x1xf32>
    %280 = vector.extract %279[0, 0, 0] : f32 from vector<1x1x1xf32>
    %cst_158 = arith.constant 3.906250e-03 : f32
    %281 = arith.mulf %280, %cst_158 : f32
    %c96_i32_159 = arith.constant 96 : i32
    %282 = vector.broadcast %c96_i32_159 : i32 to vector<1x256xi32>
    %283 = arith.cmpi sge, %117, %282 : vector<1x256xi32>
    %c128_i32_160 = arith.constant 128 : i32
    %284 = vector.broadcast %c128_i32_160 : i32 to vector<1x256xi32>
    %285 = arith.cmpi slt, %117, %284 : vector<1x256xi32>
    %286 = arith.andi %283, %285 : vector<1x256xi1>
    %cst_161 = arith.constant 9.99999974E-6 : f32
    %287 = arith.addf %281, %cst_161 : f32
    %288 = math.rsqrt %287 : f32
    %289 = vector.broadcast %288 : f32 to vector<1x256xf32>
    %290 = arith.select %286, %289, %275 : vector<1x256xi1>, vector<1x256xf32>
    %291 = vector.extract_strided_slice %229 {offsets = [0, 128], sizes = [1, 32], strides = [1, 1]} : vector<1x256xf32> to vector<1x32xf32>
    %292 = vector.shape_cast %291 : vector<1x32xf32> to vector<1x1x32xf32>
    %cst_162 = arith.constant dense<0.000000e+00> : vector<1xf32>
    %293 = vector.multi_reduction <add>, %292, %cst_162 [1, 2] : vector<1x1x32xf32> to vector<1xf32>
    %294 = vector.shape_cast %293 : vector<1xf32> to vector<1x1x1xf32>
    %295 = vector.extract %294[0, 0, 0] : f32 from vector<1x1x1xf32>
    %cst_163 = arith.constant 3.906250e-03 : f32
    %296 = arith.mulf %295, %cst_163 : f32
    %c128_i32_164 = arith.constant 128 : i32
    %297 = vector.broadcast %c128_i32_164 : i32 to vector<1x256xi32>
    %298 = arith.cmpi sge, %117, %297 : vector<1x256xi32>
    %c160_i32_165 = arith.constant 160 : i32
    %299 = vector.broadcast %c160_i32_165 : i32 to vector<1x256xi32>
    %300 = arith.cmpi slt, %117, %299 : vector<1x256xi32>
    %301 = arith.andi %298, %300 : vector<1x256xi1>
    %cst_166 = arith.constant 9.99999974E-6 : f32
    %302 = arith.addf %296, %cst_166 : f32
    %303 = math.rsqrt %302 : f32
    %304 = vector.broadcast %303 : f32 to vector<1x256xf32>
    %305 = arith.select %301, %304, %290 : vector<1x256xi1>, vector<1x256xf32>
    %306 = vector.extract_strided_slice %229 {offsets = [0, 160], sizes = [1, 32], strides = [1, 1]} : vector<1x256xf32> to vector<1x32xf32>
    %307 = vector.shape_cast %306 : vector<1x32xf32> to vector<1x1x32xf32>
    %cst_167 = arith.constant dense<0.000000e+00> : vector<1xf32>
    %308 = vector.multi_reduction <add>, %307, %cst_167 [1, 2] : vector<1x1x32xf32> to vector<1xf32>
    %309 = vector.shape_cast %308 : vector<1xf32> to vector<1x1x1xf32>
    %310 = vector.extract %309[0, 0, 0] : f32 from vector<1x1x1xf32>
    %cst_168 = arith.constant 3.906250e-03 : f32
    %311 = arith.mulf %310, %cst_168 : f32
    %c160_i32_169 = arith.constant 160 : i32
    %312 = vector.broadcast %c160_i32_169 : i32 to vector<1x256xi32>
    %313 = arith.cmpi sge, %117, %312 : vector<1x256xi32>
    %c192_i32_170 = arith.constant 192 : i32
    %314 = vector.broadcast %c192_i32_170 : i32 to vector<1x256xi32>
    %315 = arith.cmpi slt, %117, %314 : vector<1x256xi32>
    %316 = arith.andi %313, %315 : vector<1x256xi1>
    %cst_171 = arith.constant 9.99999974E-6 : f32
    %317 = arith.addf %311, %cst_171 : f32
    %318 = math.rsqrt %317 : f32
    %319 = vector.broadcast %318 : f32 to vector<1x256xf32>
    %320 = arith.select %316, %319, %305 : vector<1x256xi1>, vector<1x256xf32>
    %321 = vector.extract_strided_slice %229 {offsets = [0, 192], sizes = [1, 32], strides = [1, 1]} : vector<1x256xf32> to vector<1x32xf32>
    %322 = vector.shape_cast %321 : vector<1x32xf32> to vector<1x1x32xf32>
    %cst_172 = arith.constant dense<0.000000e+00> : vector<1xf32>
    %323 = vector.multi_reduction <add>, %322, %cst_172 [1, 2] : vector<1x1x32xf32> to vector<1xf32>
    %324 = vector.shape_cast %323 : vector<1xf32> to vector<1x1x1xf32>
    %325 = vector.extract %324[0, 0, 0] : f32 from vector<1x1x1xf32>
    %cst_173 = arith.constant 3.906250e-03 : f32
    %326 = arith.mulf %325, %cst_173 : f32
    %c192_i32_174 = arith.constant 192 : i32
    %327 = vector.broadcast %c192_i32_174 : i32 to vector<1x256xi32>
    %328 = arith.cmpi sge, %117, %327 : vector<1x256xi32>
    %c224_i32_175 = arith.constant 224 : i32
    %329 = vector.broadcast %c224_i32_175 : i32 to vector<1x256xi32>
    %330 = arith.cmpi slt, %117, %329 : vector<1x256xi32>
    %331 = arith.andi %328, %330 : vector<1x256xi1>
    %cst_176 = arith.constant 9.99999974E-6 : f32
    %332 = arith.addf %326, %cst_176 : f32
    %333 = math.rsqrt %332 : f32
    %334 = vector.broadcast %333 : f32 to vector<1x256xf32>
    %335 = arith.select %331, %334, %320 : vector<1x256xi1>, vector<1x256xf32>
    %336 = vector.extract_strided_slice %229 {offsets = [0, 224], sizes = [1, 32], strides = [1, 1]} : vector<1x256xf32> to vector<1x32xf32>
    %337 = vector.shape_cast %336 : vector<1x32xf32> to vector<1x1x32xf32>
    %cst_177 = arith.constant dense<0.000000e+00> : vector<1xf32>
    %338 = vector.multi_reduction <add>, %337, %cst_177 [1, 2] : vector<1x1x32xf32> to vector<1xf32>
    %339 = vector.shape_cast %338 : vector<1xf32> to vector<1x1x1xf32>
    %340 = vector.extract %339[0, 0, 0] : f32 from vector<1x1x1xf32>
    %cst_178 = arith.constant 3.906250e-03 : f32
    %341 = arith.mulf %340, %cst_178 : f32
    %c224_i32_179 = arith.constant 224 : i32
    %342 = vector.broadcast %c224_i32_179 : i32 to vector<1x256xi32>
    %343 = arith.cmpi sge, %117, %342 : vector<1x256xi32>
    %c256_i32_180 = arith.constant 256 : i32
    %344 = vector.broadcast %c256_i32_180 : i32 to vector<1x256xi32>
    %345 = arith.cmpi slt, %117, %344 : vector<1x256xi32>
    %346 = arith.andi %343, %345 : vector<1x256xi1>
    %cst_181 = arith.constant 9.99999974E-6 : f32
    %347 = arith.addf %341, %cst_181 : f32
    %348 = math.rsqrt %347 : f32
    %349 = vector.broadcast %348 : f32 to vector<1x256xf32>
    %350 = arith.select %346, %349, %335 : vector<1x256xi1>, vector<1x256xf32>
    %c0_182 = arith.constant 0 : index
    %c0_183 = arith.constant 0 : index
    %351 = vector.load %arg3[%c0_182, %c0_183] : memref<8x32xf32, #tpu.memory_space<vmem>>, vector<8x32xf32>
    %352 = tpu.concatenate %351, %351, %351, %351, %351, %351, %351, %351 in 1 : vector<8x32xf32>, vector<8x32xf32>, vector<8x32xf32>, vector<8x32xf32>, vector<8x32xf32>, vector<8x32xf32>, vector<8x32xf32>, vector<8x32xf32> -> vector<8x256xf32>
    %353 = vector.broadcast %350 : vector<1x256xf32> to vector<8x256xf32>
    %354 = arith.mulf %353, %352 : vector<8x256xf32>
    %c0_184 = arith.constant 0 : index
    %c0_185 = arith.constant 0 : index
    %355 = vector.load %arg4[%c0_184, %c0_185] : memref<8x32xf32, #tpu.memory_space<vmem>>, vector<8x32xf32>
    %356 = tpu.concatenate %355, %355, %355, %355, %355, %355, %355, %355 in 1 : vector<8x32xf32>, vector<8x32xf32>, vector<8x32xf32>, vector<8x32xf32>, vector<8x32xf32>, vector<8x32xf32>, vector<8x32xf32>, vector<8x32xf32> -> vector<8x256xf32>
    %357 = arith.mulf %226, %354 : vector<8x256xf32>
    %358 = arith.addf %357, %356 : vector<8x256xf32>
    %cst_186 = arith.constant 0.000000e+00 : f32
    %359 = vector.broadcast %cst_186 : f32 to vector<8x256xf32>
    %360 = arith.cmpf oge, %358, %359 : vector<8x256xf32>
    %cst_187 = arith.constant 0.00999999977 : f32
    %361 = vector.broadcast %cst_187 : f32 to vector<8x256xf32>
    %362 = arith.mulf %361, %358 : vector<8x256xf32>
    %363 = arith.select %360, %358, %362 : vector<8x256xi1>, vector<8x256xf32>
    %c0_188 = arith.constant 0 : index
    %c0_189 = arith.constant 0 : index
    %c0_190 = arith.constant 0 : index
    %364 = vector.load %arg5[%c0_188, %c0_189, %c0_190] : memref<1x8x256xf32, #tpu.memory_space<vmem>>, vector<1x8x256xf32>
    %365 = vector.shape_cast %364 : vector<1x8x256xf32> to vector<8x256xf32>
    %366 = vector.shape_cast %363 : vector<8x256xf32> to vector<1x8x256xf32>
    tpu.vector_store %arg5[%c0_188, %c0_189, %c0_190], %366 {strides = array<i32>} : memref<1x8x256xf32, #tpu.memory_space<vmem>>, vector<1x8x256xf32>,
    return
  }
  func.func @transform_0(%arg0: i32) -> (i32, i32, i32, i32) {
    %c0_i32 = arith.constant 0 : i32
    %c0_i32_0 = arith.constant 0 : i32
    %c0_i32_1 = arith.constant 0 : i32
    %c0_i32_2 = arith.constant 0 : i32
    return %arg0, %c0_i32, %c0_i32_0, %c0_i32_1 : i32, i32, i32, i32
  }
  func.func @transform_1(%arg0: i32) -> (i32, i32) {
    %c0_i32 = arith.constant 0 : i32
    %c0_i32_0 = arith.constant 0 : i32
    %c0_i32_1 = arith.constant 0 : i32
    return %c0_i32, %c0_i32_0 : i32, i32
  }
  func.func @transform_2(%arg0: i32) -> (i32, i32) {
    %c0_i32 = arith.constant 0 : i32
    %c0_i32_0 = arith.constant 0 : i32
    %c0_i32_1 = arith.constant 0 : i32
    return %c0_i32, %c0_i32_0 : i32, i32
  }
  func.func @transform_3(%arg0: i32) -> (i32, i32) {
    %c0_i32 = arith.constant 0 : i32
    %c0_i32_0 = arith.constant 0 : i32
    %c0_i32_1 = arith.constant 0 : i32
    return %c0_i32, %c0_i32_0 : i32, i32
  }
  func.func @transform_4(%arg0: i32) -> (i32, i32, i32) {
    %c0_i32 = arith.constant 0 : i32
    %c0_i32_0 = arith.constant 0 : i32
    %c0_i32_1 = arith.constant 0 : i32
    return %arg0, %c0_i32, %c0_i32_0 : i32, i32, i32
  }
}

</mosaic_0001>

<bundles_post_ra>
// kernel: tpu_custom_call.1
= control target key start
LH: loop header
LB: loop body
LE: loop exit
PB: predicated region body
PF: predicated region fallthrough
CT: control target
= control target key end

     0   :  { %9 = vsyncpa [#allocation4], 0  ;;  %s1319_s0 = inlined_call_operand.hbm [shape: f32[1,8,8,37], index: 0, kind: input, shape index: {}]   ;;  %s1320_s1 = inlined_call_operand.hbm [shape: f32[8,49], index: 1, kind: input, shape index: {}]   ;;  %s1321_s2 = inlined_call_operand.hbm [shape: f32[8,32], index: 2, kind: input, shape index: {}]   ;;  %s1322_s3 = inlined_call_operand.vmem [shape: f32[8,32], index: 3, kind: input, shape index: {}]   ;;  %s1323_s4 = inlined_call_operand.hbm [shape: f32[1,8,256], index: 4, kind: output, shape index: {}]  }
   0x1   :  { %10 = vsyncpa [#allocation7], 0 }
   0x2   :  { %11 = vsyncpa [#allocation5], 0  ;;  %s1012_s15 = smov [#allocation6]   ;;  %s1013_s17 = smov [#allocation3]  }
   0x3   :  { %s30_s16 = sshll.u32 %s1012_s15, 4  ;;  %s17_s18 = sshll.u32 %s1013_s17, 4  ;;  %s31_s16 = int_to_ptr.vmem [resolvable:$true] %s30_s16  ;;  %s1068_s18 = int_to_ptr.vmem [resolvable:$true] %s17_s18 }
   0x4   :  { %s918_s21 = scalar_lea.hbm %s1320_s1, 128 }
   0x5   :  { %p919_p0 = scmp.ne.s32.totalorder %s1320_s1, %s918_s21  ;;  %p922_p1 = scmp.lt.u32.totalorder %s918_s21, %s1320_s1 }
   0x7   :  { %p924_p2 = pnand %p922_p1, %p919_p0 }
   0x9   :  { %927 = shalt.err (!%p924_p2)
}
   0xa   :  { %s928_s26 = scalar_lea.vmem %s31_s16, 128  ;;  %p933_p4 = scmp.lt.s32.totalorder %s31_s16, %s31_s16 }
   0xb   :  { %p929_p3 = scmp.ne.s32.totalorder %s31_s16, %s928_s26  ;;  %p934_p5 = scmp.lt.s32.totalorder %s928_s26, %s928_s26 }
   0xd   :  { %p935_p6 = por %p934_p5, %p933_p4 }
   0xf   :  { %p936_p7 = pnand %p935_p6, %p929_p3 }
  0x11   :  { %939 = shalt.err (!%p936_p7)
}
  0x12   :  { %33 = dma.hbm_to_vmem [thread:$0]  %s1320_s1, 128, %s31_s16, [#allocation7]  }
  0x13   :  { %s940_s5 = scalar_lea.hbm %s1319_s0, 1024 }
  0x14   :  { %p941_p8 = scmp.ne.s32.totalorder %s1319_s0, %s940_s5  ;;  %p944_p9 = scmp.lt.u32.totalorder %s940_s5, %s1319_s0 }
  0x16   :  { %p946_p10 = pnand %p944_p9, %p941_p8 }
  0x18   :  { %949 = shalt.err (!%p946_p10)
}
  0x19   :  { %s950_s10 = scalar_lea.vmem %s1068_s18, 1024  ;;  %p955_p12 = scmp.lt.s32.totalorder %s1068_s18, %s1068_s18 }
  0x1a   :  { %p951_p11 = scmp.ne.s32.totalorder %s1068_s18, %s950_s10  ;;  %p956_p13 = scmp.lt.s32.totalorder %s950_s10, %s950_s10 }
  0x1c   :  { %p957_p0 = por %p956_p13, %p955_p12 }
  0x1e   :  { %p958_p1 = pnand %p957_p0, %p951_p11 }
  0x20   :  { %961 = shalt.err (!%p958_p1)
}
  0x21   :  { %s1014_s1 = smov 128   ;;  %s1015_s11 = smov 8  }
  0x22   :  { %23 = dma.hbm_to_vmem [thread:$0]  %s1319_s0, 1024, %s1068_s18, [#allocation4], %s1014_s1, %s1014_s1, %s1015_s11  }
  0x23   :  { %s1016_s14 = smov [#allocation8]   ;;  %s962_s19 = scalar_lea.hbm %s1321_s2, 128 }
  0x24   :  { %s40_s15 = sshll.u32 %s1016_s14, 4  ;;  %p963_p2 = scmp.ne.s32.totalorder %s1321_s2, %s962_s19  ;;  %s41_s15 = int_to_ptr.vmem [resolvable:$true] %s40_s15 }
  0x25   :  { %p966_p3 = scmp.lt.u32.totalorder %s962_s19, %s1321_s2 }
  0x27   :  { %p968_p4 = pnand %p966_p3, %p963_p2 }
  0x29   :  { %971 = shalt.err (!%p968_p4)
}
  0x2a   :  { %s972_s24 = scalar_lea.vmem %s41_s15, 128  ;;  %p977_p6 = scmp.lt.s32.totalorder %s41_s15, %s41_s15 }
  0x2b   :  { %p973_p5 = scmp.ne.s32.totalorder %s41_s15, %s972_s24  ;;  %p978_p7 = scmp.lt.s32.totalorder %s972_s24, %s972_s24 }
  0x2d   :  { %p979_p8 = por %p978_p7, %p977_p6 }
  0x2f   :  { %p980_p9 = pnand %p979_p8, %p973_p5 }
  0x31   :  { %983 = shalt.err (!%p980_p9)
}
  0x32   :  { %43 = dma.hbm_to_vmem [thread:$0]  %s1321_s2, 128, %s41_s15, [#allocation7]  }
  0x33   :  { %1006 = dma.done.wait [#allocation4], 1024  }
  0x34   :  { %1007 = vsyncadd [#allocation4], 4294966272 }
  0x35   :  { %1008 = dma.done.wait [#allocation7], 256  }
  0x36   :  { %1009 = vsyncadd [#allocation7], 4294967040  ;;  %vm63_vm0 = vcmask 261120   ;;  %v1111_v0 = vld [vmem:[#allocation3 + $0x28] sm:$0xff]  ;;  %v171_v1 = vld [vmem:[#allocation3 + $0x20] sm:$0xff]  ;;  %s1017_s25 = smov 32   ;;  %v55_v8 = vlaneseq }
  0x37   :  { %v62_v2 = vld [vmem:[#allocation3] sm:$0xff]  ;;  %197 = vrot.lane.b32.xlu1 %v1111_v0, %s1017_s25  ;;  %s1018_s26 = smov 127   ;;  %172 = vst.msk [vmem:[#allocation2 + $0x8] sm:$0xff] %vm63_vm0, %v171_v1  ;;  %s1019_s2 = smov 31   ;;  %v87_v3 = vld [vmem:[#allocation3 + $0x8] sm:$0xff]  ;;  %v222_v4 = vld [vmem:[#allocation3 + $0x30] sm:$0xff] }
  0x38   :  { %174 = vrot.lane.b32.xlu0 %v171_v1, %s1018_s26  ;;  %64 = vst.msk [vmem:[#allocation2] sm:$0xff] %vm63_vm0, %v62_v2  ;;  %s1020_s27 = smov 63   ;;  %s1021_s28 = smov 64   ;;  %v115_v5 = vld [vmem:[#allocation3 + $0x10] sm:$0xff]  ;;  %v249_v6 = vld [vmem:[#allocation3 + $0x38] sm:$0xff]  ;;  %vm57_vm1 = vcmp.lt.s32.totalorder %v55_v8, 256 }
  0x39   :  { %s1022_s29 = smov 95   ;;  %s1023_s30 = smov 96   ;;  %v143_v7 = vld [vmem:[#allocation3 + $0x18] sm:$0xff]  ;;  %v1038_v9 = vmov 1.0   ;;  %v1041_v10 = vmov 0.0   ;;  %vm92_vm2 = vcmask 523520  }
  0x3a   :  { %s1024_s5 = smov 125   ;;  %s1025_s6 = smov 126   ;;  %60 = vst.msk [vmem:[#allocation2 + $0x60] ss:$8 sm:$0x3] %vm57_vm1, %v1038_v9  ;;  %365 = vmatprep.mubr.f32.mxu0 %v1041_v10  ;;  %vm120_vm3 = vcmask 785920  }
  0x3b   :  { %201 = vrot.lane.b32.xlu1 %v1111_v0, %s1019_s2  ;;  %s1026_s7 = smov 29   ;;  %s1027_s8 = smov 30   ;;  %vm148_vm4 = vcmask 1048320   ;;  %vm294_vm5 = vcmask 1040384   ;;  %vm290_vm6 = vcmask 400384   ;;  %vm387_vm7 = vcmask 253952  }
  0x3c   :  { %66 = vrot.lane.b32.xlu0 %v62_v2, %s1018_s26  ;;  %s1028_s9 = smov 61   ;;  %s1029_s10 = smov 62  }
  0x3d   :  { %s1030_s1 = smov 93   ;;  %s1031_s11 = smov 94  }
  0x3e   :  { %s1032_s12 = smov 123   ;;  %s1033_s13 = smov 124  }
  0x3f   :  { %94 = vrot.lane.b32.xlu1 %v87_v3, %s1019_s2  ;;  %s1034_s14 = smov 27   ;;  %s1035_s15 = smov 28  }
  0x40   :  { %89 = vrot.lane.b32.xlu0 %v87_v3, %s1017_s25  ;;  %s1036_s16 = smov 59   ;;  %s1037_s17 = smov 60  }
  0x41   :  { %s1039_s19 = smov 91   ;;  %s1040_s20 = smov 92  }
  0x43   :  { %228 = vrot.lane.b32.xlu1 %v222_v4, %s1020_s27 }
  0x44   :  { %224 = vrot.lane.b32.xlu0 %v222_v4, %s1021_s28 }
  0x47   :  { %122 = vrot.lane.b32.xlu1 %v115_v5, %s1020_s27 }
  0x48   :  { %117 = vrot.lane.b32.xlu0 %v115_v5, %s1021_s28 }
  0x4b   :  { %255 = vrot.lane.b32.xlu1 %v249_v6, %s1022_s29 }
  0x4c   :  { %251 = vrot.lane.b32.xlu0 %v249_v6, %s1023_s30 }
  0x4f   :  { %150 = vrot.lane.b32.xlu1 %v143_v7, %s1022_s29 }
  0x50   :  { %145 = vrot.lane.b32.xlu0 %v143_v7, %s1023_s30 }
  0x53   :  { %182 = vrot.lane.b32.xlu1 %v171_v1, %s1024_s5 }
  0x54   :  { %178 = vrot.lane.b32.xlu0 %v171_v1, %s1025_s6 }
  0x57   :  { %74 = vrot.lane.b32.xlu1 %v62_v2, %s1024_s5 }
  0x58   :  { %70 = vrot.lane.b32.xlu0 %v62_v2, %s1025_s6 }
  0x5b   :  { %209 = vrot.lane.b32.xlu1 %v1111_v0, %s1026_s7 }
  0x5c   :  { %205 = vrot.lane.b32.xlu0 %v1111_v0, %s1027_s8 }
  0x5f   :  { %102 = vrot.lane.b32.xlu1 %v87_v3, %s1026_s7 }
  0x60   :  { %98 = vrot.lane.b32.xlu0 %v87_v3, %s1027_s8 }
  0x63   :  { %236 = vrot.lane.b32.xlu1 %v222_v4, %s1028_s9 }
  0x64   :  { %232 = vrot.lane.b32.xlu0 %v222_v4, %s1029_s10 }
  0x67   :  { %130 = vrot.lane.b32.xlu1 %v115_v5, %s1028_s9 }
  0x68   :  { %126 = vrot.lane.b32.xlu0 %v115_v5, %s1029_s10 }
  0x6b   :  { %263 = vrot.lane.b32.xlu1 %v249_v6, %s1030_s1 }
  0x6c   :  { %259 = vrot.lane.b32.xlu0 %v249_v6, %s1031_s11 }
  0x6f   :  { %158 = vrot.lane.b32.xlu1 %v143_v7, %s1030_s1 }
  0x70   :  { %154 = vrot.lane.b32.xlu0 %v143_v7, %s1031_s11 }
  0x73   :  { %190 = vrot.lane.b32.xlu1 %v171_v1, %s1032_s12 }
  0x74   :  { %186 = vrot.lane.b32.xlu0 %v171_v1, %s1033_s13 }
  0x77   :  { %82 = vrot.lane.b32.xlu1 %v62_v2, %s1032_s12 }
  0x78   :  { %78 = vrot.lane.b32.xlu0 %v62_v2, %s1033_s13 }
  0x7b   :  { %217 = vrot.lane.b32.xlu1 %v1111_v0, %s1034_s14 }
  0x7c   :  { %213 = vrot.lane.b32.xlu0 %v1111_v0, %s1035_s15 }
  0x7f   :  { %110 = vrot.lane.b32.xlu1 %v87_v3, %s1034_s14 }
  0x80   :  { %106 = vrot.lane.b32.xlu0 %v87_v3, %s1035_s15 }
  0x83   :  { %244 = vrot.lane.b32.xlu1 %v222_v4, %s1036_s16 }
  0x84   :  { %240 = vrot.lane.b32.xlu0 %v222_v4, %s1037_s17 }
  0x87   :  { %138 = vrot.lane.b32.xlu1 %v115_v5, %s1036_s16 }
  0x88   :  { %134 = vrot.lane.b32.xlu0 %v115_v5, %s1037_s17 }
  0x8b   :  { %271 = vrot.lane.b32.xlu1 %v249_v6, %s1039_s19 }
  0x8c   :  { %267 = vrot.lane.b32.xlu0 %v249_v6, %s1040_s20 }
  0x8f   :  { %166 = vrot.lane.b32.xlu1 %v143_v7, %s1039_s19 }
  0x90   :  { %162 = vrot.lane.b32.xlu0 %v143_v7, %s1040_s20 }
  0xa9   :  { %v198_v11 = vpop.permute.xlu1 %197 }
  0xaa   :  { %v175_v12 = vpop.permute.xlu0 %174  ;;  %200 = vst.msk [vmem:[#allocation2 + $0x8] sm:$0xff] %vm92_vm2, %v198_v11 }
  0xab   :  { %177 = vst.msk [vmem:[#allocation2 + $0x18] sm:$0xff] %vm63_vm0, %v175_v12  ;;  %v289_v12 = vld [vmem:[#allocation2 + $0x68] sm:$0x1] }
  0xad   :  { %v202_v13 = vpop.permute.xlu1 %201 }
  0xae   :  { %v67_v14 = vpop.permute.xlu0 %66  ;;  %204 = vst.msk [vmem:[#allocation2 + $0x18] sm:$0xff] %vm92_vm2, %v202_v13  ;;  %v288_v13 = vld [vmem:[#allocation2 + $0x60] sm:$0x1] }
  0xaf   :  { %69 = vst.msk [vmem:[#allocation2 + $0x10] sm:$0xff] %vm63_vm0, %v67_v14  ;;  %v275_v14 = vld [vmem:[#allocation6] sm:$0xff] }
  0xb1   :  { %v95_v15 = vpop.permute.xlu1 %94 }
  0xb2   :  { %v90_v16 = vpop.permute.xlu0 %89  ;;  %97 = vst.msk [vmem:[#allocation2 + $0x10] sm:$0xff] %vm92_vm2, %v95_v15 }
  0xb3   :  { %93 = vst.msk [vmem:[#allocation2] sm:$0xff] %vm92_vm2, %v90_v16 }
  0xb5   :  { %v229_v17 = vpop.permute.xlu1 %228 }
  0xb6   :  { %v225_v18 = vpop.permute.xlu0 %224  ;;  %231 = vst.msk [vmem:[#allocation2 + $0x18] sm:$0xff] %vm120_vm3, %v229_v17 }
  0xb7   :  { %227 = vst.msk [vmem:[#allocation2 + $0x8] sm:$0xff] %vm120_vm3, %v225_v18 }
  0xb9   :  { %v123_v19 = vpop.permute.xlu1 %122 }
  0xba   :  { %v118_v20 = vpop.permute.xlu0 %117  ;;  %125 = vst.msk [vmem:[#allocation2 + $0x10] sm:$0xff] %vm120_vm3, %v123_v19 }
  0xbb   :  { %121 = vst.msk [vmem:[#allocation2] sm:$0xff] %vm120_vm3, %v118_v20 }
  0xbd   :  { %v256_v21 = vpop.permute.xlu1 %255 }
  0xbe   :  { %v252_v22 = vpop.permute.xlu0 %251  ;;  %258 = vst.msk [vmem:[#allocation2 + $0x18] sm:$0xff] %vm148_vm4, %v256_v21 }
  0xbf   :  { %254 = vst.msk [vmem:[#allocation2 + $0x8] sm:$0xff] %vm148_vm4, %v252_v22 }
  0xc1   :  { %v151_v23 = vpop.permute.xlu1 %150 }
  0xc2   :  { %v146_v24 = vpop.permute.xlu0 %145  ;;  %153 = vst.msk [vmem:[#allocation2 + $0x10] sm:$0xff] %vm148_vm4, %v151_v23 }
  0xc3   :  { %149 = vst.msk [vmem:[#allocation2] sm:$0xff] %vm148_vm4, %v146_v24 }
  0xc5   :  { %v183_v25 = vpop.permute.xlu1 %182  ;;  %v279_v28 = vld [vmem:[#allocation2 + $0x18] sm:$0xff] }
  0xc6   :  { %v179_v26 = vpop.permute.xlu0 %178  ;;  %v277_v27 = vld [vmem:[#allocation2 + $0x8] sm:$0xff]  ;;  %185 = vst.msk [vmem:[#allocation2 + $0x38] sm:$0xff] %vm63_vm0, %v183_v25 }
  0xc7   :  { %181 = vst.msk [vmem:[#allocation2 + $0x28] sm:$0xff] %vm63_vm0, %v179_v26  ;;  %v811_v29 = vpack.c.bf16 %v279_v28, %v277_v27 }
  0xc9   :  { %812 = vmatprep.subr.bf16.mxu0 %v811_v29  ;;  %v75_v30 = vpop.permute.xlu1 %74  ;;  %v278_v33 = vld [vmem:[#allocation2 + $0x10] sm:$0xff] }
  0xca   :  { %v71_v31 = vpop.permute.xlu0 %70  ;;  %v276_v32 = vld [vmem:[#allocation2] sm:$0xff]  ;;  %77 = vst.msk [vmem:[#allocation2 + $0x30] sm:$0xff] %vm63_vm0, %v75_v30 }
  0xcb   :  { %73 = vst.msk [vmem:[#allocation2 + $0x20] sm:$0xff] %vm63_vm0, %v71_v31  ;;  %v813_v34 = vpack.c.bf16 %v278_v33, %v276_v32 }
  0xcd   :  { %814 = vmatpush1.bf16.msra.mxu0 %v813_v34  ;;  %v210_v35 = vpop.permute.xlu1 %209 }
  0xce   :  { %v206_v36 = vpop.permute.xlu0 %205  ;;  %212 = vst.msk [vmem:[#allocation2 + $0x38] sm:$0xff] %vm92_vm2, %v210_v35 }
  0xcf   :  { %208 = vst.msk [vmem:[#allocation2 + $0x28] sm:$0xff] %vm92_vm2, %v206_v36 }
  0xd1   :  { %v103_v37 = vpop.permute.xlu1 %102 }
  0xd2   :  { %v99_v38 = vpop.permute.xlu0 %98  ;;  %105 = vst.msk [vmem:[#allocation2 + $0x30] sm:$0xff] %vm92_vm2, %v103_v37 }
  0xd3   :  { %101 = vst.msk [vmem:[#allocation2 + $0x20] sm:$0xff] %vm92_vm2, %v99_v38 }
  0xd5   :  { %v237_v39 = vpop.permute.xlu1 %236 }
  0xd6   :  { %v233_v40 = vpop.permute.xlu0 %232  ;;  %239 = vst.msk [vmem:[#allocation2 + $0x38] sm:$0xff] %vm120_vm3, %v237_v39 }
  0xd7   :  { %235 = vst.msk [vmem:[#allocation2 + $0x28] sm:$0xff] %vm120_vm3, %v233_v40 }
  0xd9   :  { %v131_v41 = vpop.permute.xlu1 %130 }
  0xda   :  { %v127_v42 = vpop.permute.xlu0 %126  ;;  %133 = vst.msk [vmem:[#allocation2 + $0x30] sm:$0xff] %vm120_vm3, %v131_v41 }
  0xdb   :  { %129 = vst.msk [vmem:[#allocation2 + $0x20] sm:$0xff] %vm120_vm3, %v127_v42 }
  0xdd   :  { %v264_v43 = vpop.permute.xlu1 %263 }
  0xde   :  { %v260_v44 = vpop.permute.xlu0 %259  ;;  %266 = vst.msk [vmem:[#allocation2 + $0x38] sm:$0xff] %vm148_vm4, %v264_v43 }
  0xdf   :  { %262 = vst.msk [vmem:[#allocation2 + $0x28] sm:$0xff] %vm148_vm4, %v260_v44 }
  0xe1   :  { %v159_v45 = vpop.permute.xlu1 %158 }
  0xe2   :  { %v155_v46 = vpop.permute.xlu0 %154  ;;  %161 = vst.msk [vmem:[#allocation2 + $0x30] sm:$0xff] %vm148_vm4, %v159_v45 }
  0xe3   :  { %157 = vst.msk [vmem:[#allocation2 + $0x20] sm:$0xff] %vm148_vm4, %v155_v46 }
  0xe5   :  { %v191_v47 = vpop.permute.xlu1 %190  ;;  %v283_v50 = vld [vmem:[#allocation2 + $0x38] sm:$0xff] }
  0xe6   :  { %v187_v48 = vpop.permute.xlu0 %186  ;;  %v281_v49 = vld [vmem:[#allocation2 + $0x28] sm:$0xff]  ;;  %193 = vst.msk [vmem:[#allocation2 + $0x58] sm:$0xff] %vm63_vm0, %v191_v47 }
  0xe7   :  { %189 = vst.msk [vmem:[#allocation2 + $0x48] sm:$0xff] %vm63_vm0, %v187_v48  ;;  %v815_v51 = vpack.c.bf16 %v283_v50, %v281_v49 }
  0xe9   :  { %816 = vmatprep.subr.bf16.mxu0 %v815_v51  ;;  %v83_v52 = vpop.permute.xlu1 %82  ;;  %v282_v55 = vld [vmem:[#allocation2 + $0x30] sm:$0xff] }
  0xea   :  { %v79_v53 = vpop.permute.xlu0 %78  ;;  %v280_v54 = vld [vmem:[#allocation2 + $0x20] sm:$0xff]  ;;  %85 = vst.msk [vmem:[#allocation2 + $0x50] sm:$0xff] %vm63_vm0, %v83_v52 }
  0xeb   :  { %81 = vst.msk [vmem:[#allocation2 + $0x40] sm:$0xff] %vm63_vm0, %v79_v53  ;;  %v817_v56 = vpack.c.bf16 %v282_v55, %v280_v54 }
  0xed   :  { %818 = vmatpush1.bf16.msra.mxu0 %v817_v56  ;;  %v218_v57 = vpop.permute.xlu1 %217 }
  0xee   :  { %v214_v58 = vpop.permute.xlu0 %213  ;;  %220 = vst.msk [vmem:[#allocation2 + $0x58] sm:$0xff] %vm92_vm2, %v218_v57 }
  0xef   :  { %216 = vst.msk [vmem:[#allocation2 + $0x48] sm:$0xff] %vm92_vm2, %v214_v58 }
  0xf1   :  { %v111_v59 = vpop.permute.xlu1 %110 }
  0xf2   :  { %v107_v60 = vpop.permute.xlu0 %106  ;;  %113 = vst.msk [vmem:[#allocation2 + $0x50] sm:$0xff] %vm92_vm2, %v111_v59 }
  0xf3   :  { %109 = vst.msk [vmem:[#allocation2 + $0x40] sm:$0xff] %vm92_vm2, %v107_v60 }
  0xf5   :  { %v245_v61 = vpop.permute.xlu1 %244 }
  0xf6   :  { %v241_v62 = vpop.permute.xlu0 %240  ;;  %247 = vst.msk [vmem:[#allocation2 + $0x58] sm:$0xff] %vm120_vm3, %v245_v61 }
  0xf7   :  { %243 = vst.msk [vmem:[#allocation2 + $0x48] sm:$0xff] %vm120_vm3, %v241_v62 }
  0xf9   :  { %v139_v63 = vpop.permute.xlu1 %138 }
  0xfa   :  { %v135_v0 = vpop.permute.xlu0 %134  ;;  %141 = vst.msk [vmem:[#allocation2 + $0x50] sm:$0xff] %vm120_vm3, %v139_v63 }
  0xfb   :  { %137 = vst.msk [vmem:[#allocation2 + $0x40] sm:$0xff] %vm120_vm3, %v135_v0 }
  0xfd   :  { %v272_v1 = vpop.permute.xlu1 %271 }
  0xfe   :  { %v268_v2 = vpop.permute.xlu0 %267  ;;  %274 = vst.msk [vmem:[#allocation2 + $0x58] sm:$0xff] %vm148_vm4, %v272_v1 }
  0xff   :  { %270 = vst.msk [vmem:[#allocation2 + $0x48] sm:$0xff] %vm148_vm4, %v268_v2 }
 0x101   :  { %v167_v3 = vpop.permute.xlu1 %166 }
 0x102   :  { %v163_v4 = vpop.permute.xlu0 %162  ;;  %169 = vst.msk [vmem:[#allocation2 + $0x50] sm:$0xff] %vm148_vm4, %v167_v3 }
 0x103   :  { %165 = vst.msk [vmem:[#allocation2 + $0x40] sm:$0xff] %vm148_vm4, %v163_v4 }
 0x105   :  { %v287_v6 = vld [vmem:[#allocation2 + $0x58] sm:$0xff] }
 0x106   :  { %v285_v5 = vld [vmem:[#allocation2 + $0x48] sm:$0xff] }
 0x107   :  { %v819_v7 = vpack.c.bf16 %v287_v6, %v285_v5 }
 0x109   :  { %820 = vmatprep.subr.bf16.mxu0 %v819_v7  ;;  %v286_v10 = vld [vmem:[#allocation2 + $0x50] sm:$0xff] }
 0x10a   :  { %v284_v9 = vld [vmem:[#allocation2 + $0x40] sm:$0xff] }
 0x10b   :  { %v821_v11 = vpack.c.bf16 %v286_v10, %v284_v9 }
 0x10d   :  { %822 = vmatpush1.bf16.msra.mxu0 %v821_v11  ;;  %v1197_v11 = vand.u32 127, %v55_v8 }
 0x10e   :  { %808 = vmatprep.subr.msk.mxu0 %vm294_vm5, %v289_v12 }
 0x10f   :  { %vm423_vm8 = vcmp.ge.s32.totalorder %v1197_v11, 32  ;;  %vm425_vm9 = vcmp.lt.s32.totalorder %v1197_v11, 64  ;;  %vm446_vm10 = vcmp.ge.s32.totalorder %v1197_v11, 64  ;;  %vm448_vm11 = vcmp.lt.s32.totalorder %v1197_v11, 96 }
 0x110   :  { %vm401_vm12 = vcmp.lt.s32.totalorder %v1197_v11, 32  ;;  %vm1204_vm13 = vmand %vm423_vm8, %vm425_vm9  ;;  %vm469_vm15 = vcmp.ge.s32.totalorder %v1197_v11, 96 }
 0x111   :  { %809 = vmatpush1.msk.msra.mxu0 %vm294_vm5, %v288_v13  ;;  %vm1208_vm14 = vmand %vm446_vm10, %vm448_vm11  ;;  %vm762_vm10 = vcmask 785408  }
 0x112   :  { %810 = vmatmul.mubr.msk.f32.vlgmr.msra.gmra.mrb[0].mxu0 %vm290_vm6, %v275_v14 }
 0x1e5   :  { %v1174_v15 = vpop.f32.mrb[0].mxu0 }
 0x1e6   :  { %v375_v16 = vrot.slane %v1174_v15, 4  ;;  %v1177_v17 = vpop.f32.mrb[1].mxu0 }
 0x1e7   :  { %v381_v25 = vrot.slane %v1177_v17, 4 }
 0x1e8   :  { %v376_v18 = vadd.f32 %v375_v16, %v1174_v15 }
 0x1e9   :  { %v382_v29 = vadd.f32 %v381_v25, %v1177_v17 }
 0x1ea   :  { %v377_v19 = vrot.slane %v376_v18, 2 }
 0x1eb   :  { %v383_v32 = vrot.slane %v382_v29, 2 }
 0x1ec   :  { %v378_v20 = vadd.f32 %v377_v19, %v376_v18 }
 0x1ed   :  { %v384_v33 = vadd.f32 %v383_v32, %v382_v29 }
 0x1ee   :  { %v379_v21 = vrot.slane %v378_v20, 1 }
 0x1ef   :  { %v385_v34 = vrot.slane %v384_v33, 1 }
 0x1f0   :  { %v380_v22 = vadd.f32 %v379_v21, %v378_v20 }
 0x1f1   :  { %v386_v35 = vadd.f32 %v385_v34, %v384_v33 }
 0x1f2   :  { %432 = vrot.lane.b32.xlu1 %v380_v22, %s1021_s28  ;;  %409 = vrot.lane.b32.xlu0 %v380_v22, %s1023_s30  ;;  %v388_v23 = vsel %vm387_vm7, %v380_v22, 0.0 }
 0x1f3   :  { %v478_v36 = vsel %vm387_vm7, %v386_v35, 0.0 }
 0x1f6   :  { %455 = vrot.lane.b32.xlu0 %v380_v22, %s1017_s25 }
 0x216   :  { %389 = vadd.xlane.f32.xlu1 %v388_v23 }
 0x264   :  { %v410_v24 = vpop.permute.xlu0 %409  ;;  %v433_v27 = vpop.permute.xlu1 %432 }
 0x265   :  { %v412_v26 = vsel %vm387_vm7, %v410_v24, 0.0  ;;  %v435_v30 = vsel %vm387_vm7, %v433_v27, 0.0 }
 0x266   :  { %413 = vadd.xlane.f32.xlu0 %v412_v26 }
 0x268   :  { %v456_v28 = vpop.permute.xlu0 %455 }
 0x269   :  { %v458_v31 = vsel %vm387_vm7, %v456_v28, 0.0 }
 0x26a   :  { %436 = vadd.xlane.f32.xlu0 %v435_v30  ;;  %459 = vadd.xlane.f32.xlu1 %v458_v31 }
 0x27b   :  { %522 = vrot.lane.b32.xlu1 %v386_v35, %s1021_s28 }
 0x27f   :  { %545 = vrot.lane.b32.xlu1 %v386_v35, %s1017_s25 }
 0x280   :  { %499 = vrot.lane.b32.xlu0 %v386_v35, %s1023_s30 }
 0x29f   :  { %479 = vadd.xlane.f32.xlu0 %v478_v36 }
 0x2a3   :  { %v390_v37 = vpop.xlane.xlu1 %389 }
 0x2a4   :  { %v391_v38 = vrot.slane %v390_v37, 4 }
 0x2a6   :  { %v392_v39 = vadd.f32 %v391_v38, %v390_v37 }
 0x2a8   :  { %v393_v40 = vrot.slane %v392_v39, 2 }
 0x2aa   :  { %v394_v41 = vadd.f32 %v393_v40, %v392_v39 }
 0x2ac   :  { %v395_v42 = vrot.slane %v394_v41, 1 }
 0x2ae   :  { %v396_v43 = vadd.f32 %v395_v42, %v394_v41 }
 0x2b0   :  { %823 = vpush %v396_v43 }
 0x2e1   :  { %s824_s21 = spop %823 }
 0x2e2   :  { %s398_s22 = smul.f32 0.00390625, %s824_s21 }
 0x2e4   :  { %v405_v14 = vstv %s398_s22 }
 0x2e5   :  { %v406_v20 = vsel %vm401_vm12, %v405_v14, 0.0 }
 0x2f3   :  { %v414_v44 = vpop.xlane.xlu0 %413 }
 0x2f4   :  { %v415_v45 = vrot.slane %v414_v44, 4 }
 0x2f6   :  { %v416_v46 = vadd.f32 %v415_v45, %v414_v44 }
 0x2f7   :  { %v437_v47 = vpop.xlane.xlu0 %436  ;;  %v460_v48 = vpop.xlane.xlu1 %459 }
 0x2f8   :  { %v417_v49 = vrot.slane %v416_v46, 2  ;;  %v438_v50 = vrot.slane %v437_v47, 4  ;;  %v461_v51 = vrot.slane %v460_v48, 4 }
 0x2fa   :  { %v439_v52 = vadd.f32 %v438_v50, %v437_v47  ;;  %v462_v53 = vadd.f32 %v461_v51, %v460_v48  ;;  %v418_v54 = vadd.f32 %v417_v49, %v416_v46 }
 0x2fb   :  { %v523_v55 = vpop.permute.xlu1 %522  ;;  %v500_v56 = vpop.permute.xlu0 %499 }
 0x2fc   :  { %v440_v57 = vrot.slane %v439_v52, 2  ;;  %v463_v58 = vrot.slane %v462_v53, 2  ;;  %v502_v59 = vsel %vm387_vm7, %v500_v56, 0.0  ;;  %v525_v60 = vsel %vm387_vm7, %v523_v55, 0.0 }
 0x2fd   :  { %503 = vadd.xlane.f32.xlu1 %v502_v59  ;;  %526 = vadd.xlane.f32.xlu0 %v525_v60  ;;  %v419_v61 = vrot.slane %v418_v54, 1 }
 0x2fe   :  { %v441_v62 = vadd.f32 %v440_v57, %v439_v52  ;;  %v464_v63 = vadd.f32 %v463_v58, %v462_v53 }
 0x2ff   :  { %v546_v0 = vpop.permute.xlu1 %545  ;;  %v420_v1 = vadd.f32 %v419_v61, %v418_v54 }
 0x300   :  { %v548_v2 = vsel %vm387_vm7, %v546_v0, 0.0  ;;  %v442_v3 = vrot.slane %v441_v62, 1  ;;  %v465_v4 = vrot.slane %v464_v63, 1 }
 0x301   :  { %825 = vpush %v420_v1  ;;  %549 = vadd.xlane.f32.xlu0 %v548_v2  ;;  %v1232_v2 = vadd.s32 128, %v1197_v11 }
 0x302   :  { %v443_v5 = vadd.f32 %v442_v3, %v441_v62  ;;  %v466_v6 = vadd.f32 %v465_v4, %v464_v63 }
 0x303   :  { %vm514_vm1 = vcmp.ge.s32.totalorder %v1232_v2, 160  ;;  %vm516_vm2 = vcmp.lt.s32.totalorder %v1232_v2, 192  ;;  %vm492_vm3 = vcmp.lt.s32.totalorder %v1232_v2, 160  ;;  %vm537_vm5 = vcmp.ge.s32.totalorder %v1232_v2, 192 }
 0x304   :  { %827 = vpush %v443_v5  ;;  %vm1237_vm4 = vmand %vm514_vm1, %vm516_vm2  ;;  %vm539_vm6 = vcmp.lt.s32.totalorder %v1232_v2, 224  ;;  %vm560_vm9 = vcmp.ge.s32.totalorder %v1232_v2, 224 }
 0x305   :  { %829 = vpush %v466_v6  ;;  %vm1247_vm8 = vmand %vm537_vm5, %vm539_vm6 }
 0x32c   :  { %v480_v7 = vpop.xlane.xlu0 %479 }
 0x32d   :  { %v481_v9 = vrot.slane %v480_v7, 4 }
 0x32f   :  { %v482_v10 = vadd.f32 %v481_v9, %v480_v7 }
 0x331   :  { %v483_v12 = vrot.slane %v482_v10, 2 }
 0x332   :  { %s826_s23 = spop %825 }
 0x333   :  { %s422_s24 = smul.f32 0.00390625, %s826_s23  ;;  %v484_v13 = vadd.f32 %v483_v12, %v482_v10 }
 0x335   :  { %v429_v8 = vstv %s422_s24  ;;  %s828_s0 = spop %827  ;;  %v485_v18 = vrot.slane %v484_v13, 1 }
 0x336   :  { %s445_s18 = smul.f32 0.00390625, %s828_s0  ;;  %s830_s26 = spop %829  ;;  %v430_v22 = vsel %vm1204_vm13, %v429_v8, %v406_v20 }
 0x337   :  { %s468_s2 = smul.f32 0.00390625, %s830_s26  ;;  %v486_v21 = vadd.f32 %v485_v18, %v484_v13 }
 0x338   :  { %v452_v23 = vstv %s445_s18 }
 0x339   :  { %v453_v24 = vsel %vm1208_vm14, %v452_v23, %v430_v22  ;;  %v475_v25 = vstv %s468_s2  ;;  %831 = vpush %v486_v21 }
 0x33a   :  { %v476_v26 = vsel %vm469_vm15, %v475_v25, %v453_v24 }
 0x33b   :  { %v1222_v27 = vsub.f32 %v1174_v15, %v476_v26 }
 0x33d   :  { %v570_v28 = vmul.f32 %v1222_v27, %v1222_v27 }
 0x33f   :  { %v572_v29 = vrot.slane %v570_v28, 4 }
 0x341   :  { %v573_v30 = vadd.f32 %v572_v29, %v570_v28 }
 0x343   :  { %v574_v31 = vrot.slane %v573_v30, 2 }
 0x345   :  { %v575_v32 = vadd.f32 %v574_v31, %v573_v30 }
 0x347   :  { %v576_v33 = vrot.slane %v575_v32, 1 }
 0x349   :  { %v577_v34 = vadd.f32 %v576_v33, %v575_v32 }
 0x34b   :  { %603 = vrot.lane.b32.xlu0 %v577_v34, %s1023_s30  ;;  %v584_v35 = vsel %vm387_vm7, %v577_v34, 0.0 }
 0x34c   :  { %585 = vadd.xlane.f32.xlu1 %v584_v35 }
 0x36a   :  { %s832_s27 = spop %831 }
 0x36b   :  { %s488_s10 = smul.f32 0.00390625, %s832_s27 }
 0x36d   :  { %v495_v4 = vstv %s488_s10 }
 0x36e   :  { %v497_v7 = vsel %vm492_vm3, %v495_v4, 0.0 }
 0x38a   :  { %v504_v36 = vpop.xlane.xlu1 %503  ;;  %v527_v37 = vpop.xlane.xlu0 %526 }
 0x38b   :  { %v505_v38 = vrot.slane %v504_v36, 4  ;;  %v528_v39 = vrot.slane %v527_v37, 4 }
 0x38d   :  { %v506_v15 = vadd.f32 %v505_v38, %v504_v36  ;;  %v529_v40 = vadd.f32 %v528_v39, %v527_v37 }
 0x38e   :  { %v550_v41 = vpop.xlane.xlu0 %549 }
 0x38f   :  { %v507_v42 = vrot.slane %v506_v15, 2  ;;  %v530_v43 = vrot.slane %v529_v40, 2  ;;  %v551_v44 = vrot.slane %v550_v41, 4 }
 0x391   :  { %v552_v45 = vadd.f32 %v551_v44, %v550_v41  ;;  %v508_v46 = vadd.f32 %v507_v42, %v506_v15  ;;  %v531_v47 = vadd.f32 %v530_v43, %v529_v40 }
 0x393   :  { %v553_v48 = vrot.slane %v552_v45, 2  ;;  %v509_v49 = vrot.slane %v508_v46, 1  ;;  %v532_v50 = vrot.slane %v531_v47, 1 }
 0x395   :  { %v510_v51 = vadd.f32 %v509_v49, %v508_v46  ;;  %v533_v52 = vadd.f32 %v532_v50, %v531_v47  ;;  %v554_v53 = vadd.f32 %v553_v48, %v552_v45 }
 0x397   :  { %833 = vpush %v510_v51  ;;  %v555_v54 = vrot.slane %v554_v53, 1 }
 0x398   :  { %835 = vpush %v533_v52 }
 0x399   :  { %v556_v55 = vadd.f32 %v555_v54, %v554_v53 }
 0x39b   :  { %837 = vpush %v556_v55 }
 0x3bd   :  { %v604_v56 = vpop.permute.xlu0 %603 }
 0x3be   :  { %v606_v57 = vsel %vm387_vm7, %v604_v56, 0.0 }
 0x3bf   :  { %607 = vadd.xlane.f32.xlu1 %v606_v57 }
 0x3c8   :  { %s834_s29 = spop %833 }
 0x3c9   :  { %s836_s5 = spop %835  ;;  %s512_s1 = smul.f32 0.00390625, %s834_s29 }
 0x3ca   :  { %s535_s11 = smul.f32 0.00390625, %s836_s5 }
 0x3cb   :  { %v519_v6 = vstv %s512_s1 }
 0x3cc   :  { %s838_s6 = spop %837  ;;  %v521_v9 = vsel %vm1237_vm4, %v519_v6, %v497_v7  ;;  %v542_v12 = vstv %s535_s11 }
 0x3cd   :  { %s558_s12 = smul.f32 0.00390625, %s838_s6  ;;  %v544_v14 = vsel %vm1247_vm8, %v542_v12, %v521_v9 }
 0x3cf   :  { %v565_v13 = vstv %s558_s12 }
 0x3d0   :  { %624 = vrot.lane.b32.xlu1 %v577_v34, %s1021_s28  ;;  %v567_v8 = vsel %vm560_vm9, %v565_v13, %v544_v14 }
 0x3d1   :  { %v1257_v18 = vsub.f32 %v1177_v17, %v567_v8 }
 0x3d3   :  { %v571_v20 = vmul.f32 %v1257_v18, %v1257_v18 }
 0x3d4   :  { %645 = vrot.lane.b32.xlu1 %v577_v34, %s1017_s25 }
 0x3d5   :  { %v578_v21 = vrot.slane %v571_v20, 4 }
 0x3d7   :  { %v579_v22 = vadd.f32 %v578_v21, %v571_v20  ;;  %v748_v21 = vld [vmem:[#allocation8] sm:$0xff] }
 0x3d9   :  { %v586_v58 = vpop.xlane.xlu1 %585  ;;  %v580_v23 = vrot.slane %v579_v22, 2 }
 0x3da   :  { %v587_v59 = vrot.slane %v586_v58, 4 }
 0x3db   :  { %v581_v24 = vadd.f32 %v580_v23, %v579_v22  ;;  %v766_v22 = vld [vmem:[%s1322_s3] sm:$0xff] }
 0x3dc   :  { %v588_v60 = vadd.f32 %v587_v59, %v586_v58 }
 0x3dd   :  { %v582_v28 = vrot.slane %v581_v24, 1 }
 0x3de   :  { %v589_v61 = vrot.slane %v588_v60, 2 }
 0x3df   :  { %v583_v33 = vadd.f32 %v582_v28, %v581_v24 }
 0x3e0   :  { %v590_v62 = vadd.f32 %v589_v61, %v588_v60 }
 0x3e1   :  { %v666_v35 = vsel %vm387_vm7, %v583_v33, 0.0 }
 0x3e2   :  { %v591_v63 = vrot.slane %v590_v62, 1 }
 0x3e4   :  { %v592_v0 = vadd.f32 %v591_v63, %v590_v62 }
 0x3e6   :  { %839 = vpush %v592_v0 }
 0x417   :  { %s840_s7 = spop %839 }
 0x418   :  { %s594_s8 = smul.f32 0.00390625, %s840_s7 }
 0x41a   :  { %s595_s9 = sadd.f32 1e-05, %s594_s8 }
 0x41c   :  { %v596_v1 = vstv %s595_s9 }
 0x41d   :  { %902 = vrsqrt.f32 %v596_v1 }
 0x427   :  { %v903_v3 = vpop.eup %902 }
 0x428   :  { %841 = vpush %v903_v3 }
 0x44c   :  { %v608_v25 = vpop.xlane.xlu1 %607 }
 0x44d   :  { %v609_v26 = vrot.slane %v608_v25, 4 }
 0x44f   :  { %v610_v29 = vadd.f32 %v609_v26, %v608_v25 }
 0x450   :  { %v625_v30 = vpop.permute.xlu1 %624 }
 0x451   :  { %v611_v31 = vrot.slane %v610_v29, 2  ;;  %v627_v32 = vsel %vm387_vm7, %v625_v30, 0.0 }
 0x452   :  { %628 = vadd.xlane.f32.xlu0 %v627_v32 }
 0x453   :  { %v612_v34 = vadd.f32 %v611_v31, %v610_v29 }
 0x454   :  { %v646_v17 = vpop.permute.xlu1 %645 }
 0x455   :  { %v648_v36 = vsel %vm387_vm7, %v646_v17, 0.0  ;;  %v613_v37 = vrot.slane %v612_v34, 1 }
 0x456   :  { %667 = vadd.xlane.f32.xlu0 %v666_v35  ;;  %649 = vadd.xlane.f32.xlu1 %v648_v36 }
 0x457   :  { %v614_v38 = vadd.f32 %v613_v37, %v612_v34 }
 0x459   :  { %843 = vpush %v614_v38  ;;  %s1265_s13 = spop %841 }
 0x45a   :  { %v599_v59 = vstv %s1265_s13 }
 0x45b   :  { %v600_v62 = vsel %vm401_vm12, %v599_v59, 0.0 }
 0x46c   :  { %685 = vrot.lane.b32.xlu0 %v583_v33, %s1023_s30 }
 0x48a   :  { %s844_s14 = spop %843 }
 0x48b   :  { %s616_s15 = smul.f32 0.00390625, %s844_s14  ;;  %s1042_s14 = smov [#allocation9]  }
 0x48d   :  { %s617_s16 = sadd.f32 1e-05, %s616_s15  ;;  %s798_s15 = sshll.u32 %s1042_s14, 4  ;;  %s799_s15 = int_to_ptr.vmem [resolvable:$true] %s798_s15 }
 0x48e   :  { %p989_p11 = scmp.lt.s32.totalorder %s799_s15, %s799_s15 }
 0x48f   :  { %v618_v39 = vstv %s617_s16  ;;  %s984_s16 = scalar_lea.vmem %s799_s15, 256 }
 0x490   :  { %904 = vrsqrt.f32 %v618_v39  ;;  %p985_p10 = scmp.ne.s32.totalorder %s799_s15, %s984_s16  ;;  %p990_p12 = scmp.lt.s32.totalorder %s984_s16, %s984_s16 }
 0x492   :  { %p991_p13 = por %p990_p12, %p989_p11 }
 0x494   :  { %p992_p0 = pnand %p991_p13, %p985_p10 }
 0x49a   :  { %v905_v15 = vpop.eup %904 }
 0x49b   :  { %845 = vpush %v905_v15 }
 0x4cc   :  { %s846_s17 = spop %845 }
 0x4cd   :  { %v621_v61 = vstv %s846_s17 }
 0x4ce   :  { %v622_v63 = vsel %vm1204_vm13, %v621_v61, %v600_v62 }
 0x4df   :  { %v629_v40 = vpop.xlane.xlu0 %628 }
 0x4e0   :  { %v630_v41 = vrot.slane %v629_v40, 4 }
 0x4e2   :  { %v631_v42 = vadd.f32 %v630_v41, %v629_v40 }
 0x4e3   :  { %v668_v43 = vpop.xlane.xlu0 %667  ;;  %v650_v50 = vpop.xlane.xlu1 %649 }
 0x4e4   :  { %v632_v44 = vrot.slane %v631_v42, 2  ;;  %v651_v51 = vrot.slane %v650_v50, 4  ;;  %v669_v60 = vrot.slane %v668_v43, 4 }
 0x4e6   :  { %v633_v45 = vadd.f32 %v632_v44, %v631_v42  ;;  %v652_v52 = vadd.f32 %v651_v51, %v650_v50  ;;  %v670_v0 = vadd.f32 %v669_v60, %v668_v43 }
 0x4e7   :  { %v686_v46 = vpop.permute.xlu0 %685 }
 0x4e8   :  { %v688_v47 = vsel %vm387_vm7, %v686_v46, 0.0  ;;  %v634_v48 = vrot.slane %v633_v45, 1  ;;  %v653_v53 = vrot.slane %v652_v52, 2  ;;  %v671_v4 = vrot.slane %v670_v0, 2 }
 0x4e9   :  { %689 = vadd.xlane.f32.xlu1 %v688_v47 }
 0x4ea   :  { %v635_v49 = vadd.f32 %v634_v48, %v633_v45  ;;  %v654_v55 = vadd.f32 %v653_v53, %v652_v52  ;;  %v672_v7 = vadd.f32 %v671_v4, %v670_v0 }
 0x4ec   :  { %847 = vpush %v635_v49  ;;  %v655_v56 = vrot.slane %v654_v55, 1  ;;  %v673_v9 = vrot.slane %v672_v7, 1 }
 0x4ee   :  { %v656_v58 = vadd.f32 %v655_v56, %v654_v55  ;;  %v674_v13 = vadd.f32 %v673_v9, %v672_v7 }
 0x4fa   :  { %706 = vrot.lane.b32.xlu1 %v583_v33, %s1021_s28 }
 0x4fe   :  { %727 = vrot.lane.b32.xlu1 %v583_v33, %s1017_s25 }
 0x51d   :  { %s848_s19 = spop %847 }
 0x51e   :  { %s637_s20 = smul.f32 0.00390625, %s848_s19 }
 0x520   :  { %s638_s21 = sadd.f32 1e-05, %s637_s20 }
 0x522   :  { %v639_v54 = vstv %s638_s21 }
 0x523   :  { %906 = vrsqrt.f32 %v639_v54 }
 0x52d   :  { %v907_v57 = vpop.eup %906 }
 0x52e   :  { %849 = vpush %v907_v57 }
 0x52f   :  { %851 = vpush %v656_v58 }
 0x55f   :  { %s850_s22 = spop %849 }
 0x560   :  { %v642_v1 = vstv %s850_s22  ;;  %s852_s23 = spop %851 }
 0x561   :  { %v643_v3 = vsel %vm1208_vm14, %v642_v1, %v622_v63  ;;  %s658_s24 = smul.f32 0.00390625, %s852_s23 }
 0x563   :  { %s659_s0 = sadd.f32 1e-05, %s658_s24 }
 0x565   :  { %v660_v6 = vstv %s659_s0 }
 0x566   :  { %908 = vrsqrt.f32 %v660_v6 }
 0x570   :  { %v909_v12 = vpop.eup %908 }
 0x571   :  { %853 = vpush %v909_v12 }
 0x572   :  { %855 = vpush %v674_v13 }
 0x576   :  { %v690_v14 = vpop.xlane.xlu1 %689 }
 0x577   :  { %v691_v23 = vrot.slane %v690_v14, 4 }
 0x579   :  { %v692_v24 = vadd.f32 %v691_v23, %v690_v14 }
 0x57a   :  { %v707_v16 = vpop.permute.xlu1 %706 }
 0x57b   :  { %v709_v8 = vsel %vm387_vm7, %v707_v16, 0.0  ;;  %v693_v28 = vrot.slane %v692_v24, 2 }
 0x57c   :  { %710 = vadd.xlane.f32.xlu0 %v709_v8 }
 0x57d   :  { %v694_v30 = vadd.f32 %v693_v28, %v692_v24 }
 0x57e   :  { %v728_v20 = vpop.permute.xlu1 %727 }
 0x57f   :  { %v730_v19 = vsel %vm387_vm7, %v728_v20, 0.0  ;;  %v695_v31 = vrot.slane %v694_v30, 1  ;;  %vm760_vm7 = vcmask 523264  }
 0x580   :  { %731 = vadd.xlane.f32.xlu1 %v730_v19 }
 0x581   :  { %v696_v33 = vadd.f32 %v695_v31, %v694_v30 }
 0x591   :  { %753 = vrot.lane.b32.xlu1 %v748_v21, %s1021_s28 }
 0x592   :  { %750 = vrot.lane.b32.xlu0 %v748_v21, %s1017_s25 }
 0x595   :  { %774 = vrot.lane.b32.xlu1 %v766_v22, %s1023_s30 }
 0x596   :  { %756 = vrot.lane.b32.xlu0 %v748_v21, %s1023_s30 }
 0x59a   :  { %768 = vrot.lane.b32.xlu0 %v766_v22, %s1017_s25 }
 0x59e   :  { %771 = vrot.lane.b32.xlu0 %v766_v22, %s1021_s28 }
 0x5a2   :  { %s854_s2 = spop %853 }
 0x5a3   :  { %v663_v25 = vstv %s854_s2  ;;  %s856_s27 = spop %855 }
 0x5a4   :  { %v664_v26 = vsel %vm469_vm15, %v663_v25, %v643_v3  ;;  %s676_s29 = smul.f32 0.00390625, %s856_s27 }
 0x5a6   :  { %s677_s5 = sadd.f32 1e-05, %s676_s29 }
 0x5a8   :  { %v678_v29 = vstv %s677_s5 }
 0x5a9   :  { %910 = vrsqrt.f32 %v678_v29 }
 0x5b3   :  { %v911_v32 = vpop.eup %910 }
 0x5b4   :  { %857 = vpush %v911_v32 }
 0x5b5   :  { %859 = vpush %v696_v33 }
 0x5e5   :  { %s1290_s3 = spop %857 }
 0x5e6   :  { %s860_s25 = spop %859  ;;  %v681_v58 = vstv %s1290_s3 }
 0x5e7   :  { %s698_s28 = smul.f32 0.00390625, %s860_s25  ;;  %v683_v59 = vsel %vm492_vm3, %v681_v58, 0.0 }
 0x5e9   :  { %s699_s30 = sadd.f32 1e-05, %s698_s28 }
 0x5eb   :  { %v700_v34 = vstv %s699_s30 }
 0x5ec   :  { %912 = vrsqrt.f32 %v700_v34 }
 0x5f6   :  { %v913_v11 = vpop.eup %912 }
 0x5f7   :  { %861 = vpush %v913_v11 }
 0x609   :  { %v711_v17 = vpop.xlane.xlu0 %710 }
 0x60a   :  { %v712_v35 = vrot.slane %v711_v17, 4 }
 0x60c   :  { %v713_v36 = vadd.f32 %v712_v35, %v711_v17 }
 0x60d   :  { %v751_v37 = vpop.permute.xlu0 %750  ;;  %v732_v38 = vpop.xlane.xlu1 %731 }
 0x60e   :  { %v714_v39 = vrot.slane %v713_v36, 2  ;;  %v759_v15 = vsel %vm63_vm0, %v748_v21, %v751_v37  ;;  %v733_v62 = vrot.slane %v732_v38, 4 }
 0x610   :  { %v715_v40 = vadd.f32 %v714_v39, %v713_v36  ;;  %v734_v63 = vadd.f32 %v733_v62, %v732_v38 }
 0x611   :  { %v757_v41 = vpop.permute.xlu0 %756  ;;  %v754_v42 = vpop.permute.xlu1 %753 }
 0x612   :  { %v761_v43 = vsel %vm760_vm7, %v759_v15, %v754_v42  ;;  %v716_v44 = vrot.slane %v715_v40, 1 }
 0x613   :  { %v763_v45 = vsel %vm762_vm10, %v761_v43, %v757_v41 }
 0x614   :  { %v717_v46 = vadd.f32 %v716_v44, %v715_v40  ;;  %v764_v48 = vmul.f32 %v763_v45, %v664_v26 }
 0x615   :  { %v769_v47 = vpop.permute.xlu0 %768  ;;  %v775_v50 = vpop.permute.xlu1 %774 }
 0x616   :  { %863 = vpush %v717_v46  ;;  %v777_v49 = vsel %vm63_vm0, %v766_v22, %v769_v47  ;;  %v780_v53 = vmul.f32 %v764_v48, %v1222_v27  ;;  %v735_v27 = vrot.slane %v734_v63, 2 }
 0x618   :  { %v736_v1 = vadd.f32 %v735_v27, %v734_v63 }
 0x619   :  { %v772_v51 = vpop.permute.xlu0 %771 }
 0x61a   :  { %v778_v52 = vsel %vm760_vm7, %v777_v49, %v772_v51  ;;  %v737_v3 = vrot.slane %v736_v1, 1 }
 0x61b   :  { %v779_v54 = vsel %vm762_vm10, %v778_v52, %v775_v50 }
 0x61c   :  { %v782_v55 = vadd.f32 %v780_v53, %v779_v54  ;;  %v738_v6 = vadd.f32 %v737_v3, %v736_v1 }
 0x61e   :  { %v786_v56 = vmul.f32 0.01, %v782_v55  ;;  %vm784_vm11 = vcmp.ge.f32.partialorder %v782_v55, 0.0 }
 0x620   :  { %v788_v57 = vsel %vm784_vm11, %v782_v55, %v786_v56 }
 0x621   :  { %790 = vst [vmem:[#allocation9] sm:$0xff] %v788_v57 }
 0x628   :  { %s862_s6 = spop %861 }
 0x629   :  { %v703_v60 = vstv %s862_s6 }
 0x62a   :  { %v705_v61 = vsel %vm1237_vm4, %v703_v60, %v683_v59 }
 0x647   :  { %s864_s7 = spop %863 }
 0x648   :  { %s719_s8 = smul.f32 0.00390625, %s864_s7 }
 0x64a   :  { %s720_s9 = sadd.f32 1e-05, %s719_s8 }
 0x64c   :  { %v721_v0 = vstv %s720_s9 }
 0x64d   :  { %914 = vrsqrt.f32 %v721_v0 }
 0x657   :  { %v915_v4 = vpop.eup %914 }
 0x658   :  { %865 = vpush %v915_v4 }
 0x659   :  { %867 = vpush %v738_v6 }
 0x689   :  { %s866_s10 = spop %865 }
 0x68a   :  { %v724_v7 = vstv %s866_s10  ;;  %s868_s1 = spop %867 }
 0x68b   :  { %v726_v5 = vsel %vm1247_vm8, %v724_v7, %v705_v61  ;;  %s740_s11 = smul.f32 0.00390625, %s868_s1 }
 0x68d   :  { %s741_s12 = sadd.f32 1e-05, %s740_s11 }
 0x68f   :  { %v742_v9 = vstv %s741_s12 }
 0x690   :  { %916 = vrsqrt.f32 %v742_v9 }
 0x69a   :  { %v917_v12 = vpop.eup %916 }
 0x69b   :  { %869 = vpush %v917_v12 }
 0x6cc   :  { %s870_s13 = spop %869 }
 0x6cd   :  { %v745_v13 = vstv %s870_s13 }
 0x6ce   :  { %v747_v14 = vsel %vm560_vm9, %v745_v13, %v726_v5 }
 0x6cf   :  { %v765_v16 = vmul.f32 %v763_v45, %v747_v14 }
 0x6d1   :  { %v781_v8 = vmul.f32 %v765_v16, %v1257_v18 }
 0x6d3   :  { %v783_v20 = vadd.f32 %v781_v8, %v779_v54 }
 0x6d5   :  { %vm785_vm0 = vcmp.ge.f32.partialorder %v783_v20, 0.0  ;;  %v787_v10 = vmul.f32 0.01, %v783_v20 }
 0x6d7   :  { %v789_v19 = vsel %vm785_vm0, %v783_v20, %v787_v10 }
 0x6d8   :  { %791 = vst [vmem:[#allocation9 + $0x8] sm:$0xff] %v789_v19 }
 0x6d9   :  { %995 = shalt.err (!%p992_p0)
}
 0x6da   :  { %s996_s20 = scalar_lea.hbm %s1323_s4, 256 }
 0x6db   :  { %p997_p1 = scmp.ne.s32.totalorder %s1323_s4, %s996_s20  ;;  %p1000_p2 = scmp.lt.u32.totalorder %s996_s20, %s1323_s4 }
 0x6dd   :  { %p1002_p3 = pnand %p1000_p2, %p997_p1 }
 0x6df   :  { %1005 = shalt.err (!%p1002_p3)
}
 0x6e0   :  { %801 = dma.vmem_to_hbm [thread:$0]  %s799_s15, 256, %s1323_s4, [#allocation5]  }
 0x6e1   :  { %1010 = dma.done.wait [#allocation5], 256  }
 0x6e2   :  { %1011 = vsyncadd [#allocation5], 4294967040 }
 0x6e3   :  { %805 = vsyncpa [#allocation4], 1 }
 0x6e4   :  { %806 = vsyncpa [#allocation7], 1 }
 0x6e5   :  { %807 = vsyncpa [#allocation5], 1 }

</bundles_post_ra>
